<compile_context>
chip_gen: v7x
topology: tpu7x:2x2x1
jax: 0.10.0
libtpu: 0.0.40
codegen_flags: <defaults>
</compile_context>

<pallas_src>
import functools
import math

import numpy as np
import jax
import jax.numpy as jnp
from jax.experimental import pallas as pl
from jax.experimental.pallas import tpu as pltpu


CONFIG = dict(vocab_size=100, hidden=32, num_layers=2, num_heads=4,
              intermediate=64, max_position=16, type_vocab=2, max_len=16)
LN_EPS = 1e-12  # BERT LayerNorm eps


# ------------------------- in-kernel helper math ---------------------------

def _layernorm(x, g, b, eps=LN_EPS):
    mean = jnp.mean(x, axis=-1, keepdims=True)
    xc = x - mean
    var = jnp.mean(xc * xc, axis=-1, keepdims=True)
    return xc * jax.lax.rsqrt(var + eps) * g + b


def _gelu(x):
    # TODO(synk): HF hidden_act='gelu' is the exact erf form; erf lowering in
    # Mosaic is not guaranteed, so the tanh approximation is used (tiny delta).
    return 0.5 * x * (1.0 + jnp.tanh(0.7978845608028654 * (x + 0.044715 * x * x * x)))


# ------------------------------ fused kernel -------------------------------

def _encoder_kernel(emb_hbm, wqkv_ref, wo_ref, wi_ref, wf_ref, lvec_ref,
                    pw_ref, cvec_ref,
                    pooled_ref,
                    h_ref,
                    *, Bt, S, num_heads):
    """grid = (batch_tiles, num_layers); hidden state lives in h_ref."""
    bt = pl.program_id(0)            # batch tile  -> "parallel" (megacore)
    l = pl.program_id(1)             # layer       -> "arbitrary" (h carries)
    Mt, H = h_ref.shape
    dh = H // num_heads
    I = wi_ref.shape[-1]
    scale = 1.0 / math.sqrt(dh)
    bf16 = jnp.bfloat16

    # Layer 0: DMA this batch tile's embeddings straight from HBM into the
    # resident hidden-state scratch (emb never occupies a pipelined VMEM
    # block), then apply the embedding LayerNorm in place.
    @pl.when(l == 0)
    def _():
        off = bt * Mt
        pltpu.sync_copy(emb_hbm.at[pl.ds(off, Mt), :], h_ref)
        h_ref[...] = _layernorm(h_ref[...], cvec_ref[0:1, :], cvec_ref[1:2, :])

    h = h_ref[...]                                    # f32 [Mt, H]
    hb = h.astype(bf16)

    # Packed per-layer vectors: one DMA descriptor instead of 8.
    lv = lvec_ref[0]                                  # f32 [8, W]
    b_qkv = lv[0:1, :3 * H]
    b_o = lv[1:2, :H]
    g1 = lv[2:3, :H]
    be1 = lv[3:4, :H]
    b_i = lv[4:5, :I]
    b_f = lv[5:6, :H]
    g2 = lv[6:7, :H]
    be2 = lv[7:8, :H]

    # Fused QKV projection: bf16 MXU operands, f32 accumulation.
    qkv = jnp.dot(hb, wqkv_ref[0], preferred_element_type=jnp.float32) + b_qkv
    # Fold the softmax 1/sqrt(dh) scale into q ([Mt,H] mul, not [B,S,S]).
    q = (qkv[:, 0:H] * scale).astype(bf16)
    k = qkv[:, H:2 * H].astype(bf16)
    v = qkv[:, 2 * H:3 * H].astype(bf16)

    # Self-attention.  NOTE: the reference passes only input_ids to BertModel,
    # so HF uses an all-ones attention mask -> padding positions are NOT
    # masked; we intentionally do the same.  Softmax / exp in f32.
    wo = wo_ref[0]                                    # bf16 [H, H]
    attn = jnp.zeros((Mt, H), jnp.float32)
    for hd in range(num_heads):                       # unrolled at trace time
        sl = slice(hd * dh, (hd + 1) * dh)
        qh = q[:, sl].reshape(Bt, S, dh)
        kh = k[:, sl].reshape(Bt, S, dh)
        vh = v[:, sl].reshape(Bt, S, dh)
        s = jnp.einsum("bqd,bkd->bqk", qh, kh, preferred_element_type=jnp.float32)
        s = s - jnp.max(s, axis=-1, keepdims=True)
        p = jnp.exp(s)
        p = p * pl.reciprocal(jnp.sum(p, axis=-1, keepdims=True), approx=True)
        ch = jnp.einsum("bqk,bkd->bqd", p.astype(bf16), vh,
                        preferred_element_type=jnp.float32)
        # Head merge folded into the output projection: no lane-axis concat,
        # ctx_h is consumed immediately.
        attn = attn + jnp.dot(ch.reshape(Mt, dh).astype(bf16), wo[sl, :],
                              preferred_element_type=jnp.float32)

    # Attention output + Add&Norm (f32).
    h1 = _layernorm(attn + b_o + h, g1, be1)

    # Feed-forward (GELU) + Add&Norm.
    inter = _gelu(jnp.dot(h1.astype(bf16), wi_ref[0],
                          preferred_element_type=jnp.float32) + b_i)
    ff = jnp.dot(inter.astype(bf16), wf_ref[0],
                 preferred_element_type=jnp.float32) + b_f
    h2 = _layernorm(ff + h1, g2, be2)
    h_ref[...] = h2                                   # carry to next layer

    # Pooler on the final layer: tanh(CLS @ W + b).
    @pl.when(l == pl.num_programs(1) - 1)
    def _():
        cls = h2.reshape(Bt, S, H)[:, 0, :]           # [Bt, H]
        pooled = jnp.tanh(jnp.dot(cls.astype(bf16), pw_ref[...],
                                  preferred_element_type=jnp.float32)
                          + cvec_ref[2:3, :])
        pooled_ref[...] = pooled[None]


# ------------------------------ parameters ---------------------------------

def init_params(key, cfg):
    H, I, L = cfg["hidden"], cfg["intermediate"], cfg["num_layers"]
    W = max(3 * H, I)

    def dense(k, fan_in, fan_out):
        return jax.random.normal(k, (fan_in, fan_out), jnp.float32) * 0.02

    keys = jax.random.split(key, 4 + L)
    layer_keys = [jax.random.split(keys[4 + l], 6) for l in range(L)]

    def pad_row(v):
        return jnp.pad(v, (0, W - v.shape[0]))

    # All per-layer vectors packed into one [L, 8, W] f32 tensor.
    # rows: [b_qkv, b_o, ln1_g, ln1_b, b_i, b_f, ln2_g, ln2_b]
    layer_vecs = jnp.stack([
        jnp.stack([pad_row(jnp.zeros((3 * H,), jnp.float32)),
                   pad_row(jnp.zeros((H,), jnp.float32)),
                   pad_row(jnp.ones((H,), jnp.float32)),
                   pad_row(jnp.zeros((H,), jnp.float32)),
                   pad_row(jnp.zeros((I,), jnp.float32)),
                   pad_row(jnp.zeros((H,), jnp.float32)),
                   pad_row(jnp.ones((H,), jnp.float32)),
                   pad_row(jnp.zeros((H,), jnp.float32))])
        for _ in range(L)])

    # Packed constants: emb_ln_g, emb_ln_b, pooler_b.
    const_vecs = jnp.stack([jnp.ones((H,), jnp.float32),
                            jnp.zeros((H,), jnp.float32),
                            jnp.zeros((H,), jnp.float32)])

    return {
        "word_emb": jax.random.normal(keys[0], (cfg["vocab_size"], H), jnp.float32) * 0.02,
        "pos_emb": jax.random.normal(keys[1], (cfg["max_position"], H), jnp.float32) * 0.02,
        "type_emb": jax.random.normal(keys[2], (cfg["type_vocab"], H), jnp.float32) * 0.02,
        # Matmul weights stored bf16 in HBM: half the DMA bytes / VMEM, native
        # MXU bf16 rate.  Elementwise math stays f32 in the kernel.
        "pooler_w": dense(keys[3], H, H).astype(jnp.bfloat16),
        "w_qkv": jnp.stack([jnp.concatenate(
            [dense(lk[0], H, H), dense(lk[1], H, H), dense(lk[2], H, H)], axis=1)
            for lk in layer_keys]).astype(jnp.bfloat16),                 # [L, H, 3H]
        "w_o": jnp.stack([dense(lk[3], H, H) for lk in layer_keys]).astype(jnp.bfloat16),
        "w_i": jnp.stack([dense(lk[4], H, I) for lk in layer_keys]).astype(jnp.bfloat16),
        "w_f": jnp.stack([dense(lk[5], I, H) for lk in layer_keys]).astype(jnp.bfloat16),
        "layer_vecs": layer_vecs,                                        # [L, 8, W]
        "const_vecs": const_vecs,                                        # [3, H]
    }


# ------------------------------ forward pass --------------------------------

def bert_encoder_forward(params, input_ids, cfg, *, batch_tiles=None):
    """Mirrors bert_encoder.forward: returns the pooled output [B, H]."""
    B, S = input_ids.shape
    H, I = cfg["hidden"], cfg["intermediate"]
    L, nh = cfg["num_layers"], cfg["num_heads"]
    M = B * S
    W = params["layer_vecs"].shape[-1]

    if batch_tiles is None:
        # One batch row per tile here; at real sizes pick >= #TensorCores
        # (2 on v7x) while keeping Bt*S*H inside the VMEM budget.
        batch_tiles = B
    assert B % batch_tiles == 0
    Bt = B // batch_tiles
    Mt = Bt * S

    # Embedding gather stays in JAX glue (data-dependent gather; no clean
    # rectangular BlockSpec).  Everything downstream is ONE Pallas kernel.
    emb = (params["word_emb"][input_ids]
           + params["pos_emb"][:S][None, :, :]
           + params["type_emb"][0][None, None, :]).astype(jnp.float32).reshape(M, H)

    layer3d = lambda shape: pl.BlockSpec((1,) + shape, lambda bt, l: (l, 0, 0))
    const2d = lambda shape: pl.BlockSpec(shape, lambda bt, l: (0, 0))

    # Cost hint for XLA scheduling around the custom call.
    flops = (L * (2 * M * H * 3 * H + 4 * B * S * S * H + 2 * M * H * H
                  + 4 * M * H * I) + 2 * B * H * H)
    transcendentals = L * (B * nh * S * S + M * I) + B * H
    bytes_accessed = int(4 * M * H
                         + 2 * batch_tiles * L * (3 * H * H + H * H + 2 * H * I)
                         + 4 * batch_tiles * L * 8 * W
                         + 2 * H * H + 4 * (3 * H + B * H))

    # Scoped VMEM sized to the fused-layer working set (+margin), capped at
    # v7x's 64 MiB physical VMEM.
    w_layer_bytes = 2 * (3 * H * H + H * H + 2 * H * I) + 4 * 8 * W
    work = (4 * Mt * H                        # resident hidden state (f32)
            + 2 * w_layer_bytes               # double-buffered streamed weights
            + 2 * H * H + 4 * 3 * H           # pooler weight + packed constants
            + 4 * Mt * (3 * H + I + 2 * H)    # qkv / ffn / attn intermediates
            + 4 * nh * Bt * S * S             # attention scores
            + 2 * 4 * Bt * H)                 # output block
    vmem_limit = int(min(64 * 1024 * 1024, max(16 * 1024 * 1024, 4 * work)))

    kernel = functools.partial(_encoder_kernel, Bt=Bt, S=S, num_heads=nh)
    pooled = pl.pallas_call(
        kernel,
        out_shape=jax.ShapeDtypeStruct((batch_tiles, Bt, H), jnp.float32),
        grid=(batch_tiles, L),
        in_specs=[
            pl.BlockSpec(memory_space=pl.ANY),  # embeddings stay in HBM; DMA'd once per tile
            layer3d((H, 3 * H)),                # w_qkv (bf16)
            layer3d((H, H)),                    # w_o   (bf16)
            layer3d((H, I)),                    # w_i   (bf16)
            layer3d((I, H)),                    # w_f   (bf16)
            layer3d((8, W)),                    # packed per-layer vectors (f32)
            const2d((H, H)),                    # pooler_w (bf16)
            const2d((3, H)),                    # packed emb_ln_g/b + pooler_b (f32)
        ],
        out_specs=pl.BlockSpec((1, Bt, H), lambda bt, l: (bt, 0, 0)),
        scratch_shapes=[pltpu.VMEM((Mt, H), jnp.float32)],  # resident hidden state
        compiler_params=pltpu.CompilerParams(
            dimension_semantics=("parallel", "arbitrary"),  # batch tiles parallel, layers sequential
            vmem_limit_bytes=vmem_limit),
        cost_estimate=pl.CostEstimate(flops=flops,
                                      transcendentals=transcendentals,
                                      bytes_accessed=bytes_accessed),
    )(emb, params["w_qkv"], params["w_o"], params["w_i"], params["w_f"],
      params["layer_vecs"], params["pooler_w"], params["const_vecs"])
    return pooled.reshape(B, H)


# TODO(synk): BertTokenizer (and loading pretrained weights from disk) has no
# Pallas/JAX equivalent; a deterministic character hash stands in for
# tokenize + convert_tokens_to_ids + pad-with-0, and weights are random-init.
def fake_tokenize(sentences, vocab_size, max_len):
    ids = []
    for s in sentences:
        toks = [(ord(c) % (vocab_size - 1)) + 1 for c in str(s)][:max_len]
        toks = toks + [0] * max(0, max_len - len(toks))
        ids.append(toks)
    return jnp.asarray(np.array(ids, dtype=np.int32))


if __name__ == "__main__":
    cfg = CONFIG
    params = init_params(jax.random.PRNGKey(0), cfg)

    sentences = ["pallas tpu kernels", "bert encoder forward"]
    input_ids = fake_tokenize(sentences, cfg["vocab_size"], cfg["max_len"])  # [2, 16]

    pooled = bert_encoder_forward(params, input_ids, cfg)
    pooled = jax.block_until_ready(pooled)
    out = np.asarray(pooled)   # mirrors .detach().cpu().numpy()
    assert out.shape == (2, cfg["hidden"]) and out.dtype == np.float32
    assert np.all(np.isfinite(out))
    print("KERNEL_OK")
</pallas_src>

<mosaic_0001>
module attributes {stable_mosaic.version = 11 : i64} {
  func.func @_encoder_kernel(%arg0: i32, %arg1: i32, %arg2: memref<32x32xf32, #tpu.memory_space<any>>, %arg3: memref<1x32x96xbf16, #tpu.memory_space<vmem>>, %arg4: memref<1x32x32xbf16, #tpu.memory_space<vmem>>, %arg5: memref<1x32x64xbf16, #tpu.memory_space<vmem>>, %arg6: memref<1x64x32xbf16, #tpu.memory_space<vmem>>, %arg7: memref<1x8x96xf32, #tpu.memory_space<vmem>>, %arg8: memref<32x32xbf16, #tpu.memory_space<vmem>>, %arg9: memref<3x32xf32, #tpu.memory_space<vmem>>, %arg10: memref<1x1x32xf32, #tpu.memory_space<vmem>>, %arg11: memref<16x32xf32, #tpu.memory_space<vmem>>) attributes {dimension_semantics = [#tpu.dimension_semantics<parallel>, #tpu.dimension_semantics<arbitrary>], iteration_bounds = array<i64: 2, 2>, scalar_prefetch = 0 : i64, scratch_operands = 1 : i64, tpu.core_type = #tpu.core_type<tc>, window_params = [{}, {transform_indices = @transform_1, window_bounds = array<i64: 1, 32, 96>}, {transform_indices = @transform_2, window_bounds = array<i64: 1, 32, 32>}, {transform_indices = @transform_3, window_bounds = array<i64: 1, 32, 64>}, {transform_indices = @transform_4, window_bounds = array<i64: 1, 64, 32>}, {transform_indices = @transform_5, window_bounds = array<i64: 1, 8, 96>}, {pipeline_mode = #tpu.pipeline_mode<synchronous>, transform_indices = @transform_6, window_bounds = array<i64: 32, 32>}, {pipeline_mode = #tpu.pipeline_mode<synchronous>, transform_indices = @transform_7, window_bounds = array<i64: 3, 32>}, {transform_indices = @transform_8, window_bounds = array<i64: 1, 1, 32>}]} {
    %c0_i32 = arith.constant 0 : i32
    %0 = arith.cmpi eq, %arg1, %c0_i32 : i32
    %1 = arith.extui %0 : i1 to i32
    %c0_i32_0 = arith.constant 0 : i32
    %2 = arith.cmpi ne, %1, %c0_i32_0 : i32
    scf.if %2 {
      %c16_i32 = arith.constant 16 : i32
      %200 = arith.muli %arg0, %c16_i32 : i32
      "tpu.region"() ({
        %225 = tpu.sem_alloc : memref<!tpu.dma_semaphore, #tpu.memory_space<semaphore_mem>>
        %c0_i32_70 = arith.constant 0 : i32
        %226 = tpu.memref_slice %arg2[%200, %c0_i32_70] : memref<32x32xf32, #tpu.memory_space<any>> -> memref<16x32xf32, #tpu.memory_space<any>>
        tpu.enqueue_dma source(%226 : memref<16x32xf32, #tpu.memory_space<any>>) target(%arg11 : memref<16x32xf32, #tpu.memory_space<vmem>>) target_semaphore(%225 : memref<!tpu.dma_semaphore, #tpu.memory_space<semaphore_mem>>)
        %c0_i32_71 = arith.constant 0 : i32
        %227 = tpu.memref_slice %arg2[%200, %c0_i32_71] : memref<32x32xf32, #tpu.memory_space<any>> -> memref<16x32xf32, #tpu.memory_space<any>>
        tpu.wait_dma2 semaphore(%225 : memref<!tpu.dma_semaphore, #tpu.memory_space<semaphore_mem>>) src(%227 : memref<16x32xf32, #tpu.memory_space<any>>) dst(%arg11 : memref<16x32xf32, #tpu.memory_space<vmem>>)
        tpu.yield
      }) : () -> ()
      %c0_58 = arith.constant 0 : index
      %c0_59 = arith.constant 0 : index
      %201 = vector.load %arg11[%c0_58, %c0_59] : memref<16x32xf32, #tpu.memory_space<vmem>>, vector<16x32xf32>
      %c0_60 = arith.constant 0 : index
      %c0_61 = arith.constant 0 : index
      %202 = vector.load %arg9[%c0_60, %c0_61] : memref<3x32xf32, #tpu.memory_space<vmem>>, vector<1x32xf32>
      %c1 = arith.constant 1 : index
      %c0_62 = arith.constant 0 : index
      %203 = vector.load %arg9[%c1, %c0_62] : memref<3x32xf32, #tpu.memory_space<vmem>>, vector<1x32xf32>
      %cst_63 = arith.constant dense<0.000000e+00> : vector<16xf32>
      %204 = vector.multi_reduction <add>, %201, %cst_63 [1] : vector<16x32xf32> to vector<16xf32>
      %205 = vector.shape_cast %204 : vector<16xf32> to vector<16x1xf32>
      %cst_64 = arith.constant 3.200000e+01 : f32
      %206 = vector.broadcast %cst_64 : f32 to vector<16x1xf32>
      %207 = arith.divf %205, %206 : vector<16x1xf32>
      %208 = vector.broadcast %207 : vector<16x1xf32> to vector<16x32xf32>
      %209 = arith.subf %201, %208 : vector<16x32xf32>
      %210 = arith.mulf %209, %209 : vector<16x32xf32>
      %cst_65 = arith.constant dense<0.000000e+00> : vector<16xf32>
      %211 = vector.multi_reduction <add>, %210, %cst_65 [1] : vector<16x32xf32> to vector<16xf32>
      %212 = vector.shape_cast %211 : vector<16xf32> to vector<16x1xf32>
      %cst_66 = arith.constant 3.200000e+01 : f32
      %213 = vector.broadcast %cst_66 : f32 to vector<16x1xf32>
      %214 = arith.divf %212, %213 : vector<16x1xf32>
      %cst_67 = arith.constant 9.99999996E-13 : f32
      %215 = vector.broadcast %cst_67 : f32 to vector<16x1xf32>
      %216 = arith.addf %214, %215 : vector<16x1xf32>
      %217 = math.rsqrt %216 : vector<16x1xf32>
      %218 = vector.broadcast %217 : vector<16x1xf32> to vector<16x32xf32>
      %219 = arith.mulf %209, %218 : vector<16x32xf32>
      %220 = vector.broadcast %202 : vector<1x32xf32> to vector<16x32xf32>
      %221 = arith.mulf %219, %220 : vector<16x32xf32>
      %222 = vector.broadcast %203 : vector<1x32xf32> to vector<16x32xf32>
      %223 = arith.addf %221, %222 : vector<16x32xf32>
      %c0_68 = arith.constant 0 : index
      %c0_69 = arith.constant 0 : index
      %224 = vector.load %arg11[%c0_68, %c0_69] : memref<16x32xf32, #tpu.memory_space<vmem>>, vector<16x32xf32>
      tpu.vector_store %arg11[%c0_68, %c0_69], %223 {strides = array<i32>} : memref<16x32xf32, #tpu.memory_space<vmem>>, vector<16x32xf32>,
    } else {
    }
    %c0 = arith.constant 0 : index
    %c0_1 = arith.constant 0 : index
    %3 = vector.load %arg11[%c0, %c0_1] : memref<16x32xf32, #tpu.memory_space<vmem>>, vector<16x32xf32>
    %4 = arith.truncf %3 : vector<16x32xf32> to vector<16x32xbf16>
    %c0_2 = arith.constant 0 : index
    %c0_3 = arith.constant 0 : index
    %c0_4 = arith.constant 0 : index
    %5 = vector.load %arg7[%c0_2, %c0_3, %c0_4] : memref<1x8x96xf32, #tpu.memory_space<vmem>>, vector<1x8x96xf32>
    %6 = vector.shape_cast %5 : vector<1x8x96xf32> to vector<8x96xf32>
    %7 = vector.extract_strided_slice %6 {offsets = [0, 0], sizes = [1, 96], strides = [1, 1]} : vector<8x96xf32> to vector<1x96xf32>
    %8 = vector.extract_strided_slice %6 {offsets = [1, 0], sizes = [1, 32], strides = [1, 1]} : vector<8x96xf32> to vector<1x32xf32>
    %9 = vector.extract_strided_slice %6 {offsets = [2, 0], sizes = [1, 32], strides = [1, 1]} : vector<8x96xf32> to vector<1x32xf32>
    %10 = vector.extract_strided_slice %6 {offsets = [3, 0], sizes = [1, 32], strides = [1, 1]} : vector<8x96xf32> to vector<1x32xf32>
    %11 = vector.extract_strided_slice %6 {offsets = [4, 0], sizes = [1, 64], strides = [1, 1]} : vector<8x96xf32> to vector<1x64xf32>
    %12 = vector.extract_strided_slice %6 {offsets = [5, 0], sizes = [1, 32], strides = [1, 1]} : vector<8x96xf32> to vector<1x32xf32>
    %13 = vector.extract_strided_slice %6 {offsets = [6, 0], sizes = [1, 32], strides = [1, 1]} : vector<8x96xf32> to vector<1x32xf32>
    %14 = vector.extract_strided_slice %6 {offsets = [7, 0], sizes = [1, 32], strides = [1, 1]} : vector<8x96xf32> to vector<1x32xf32>
    %c0_5 = arith.constant 0 : index
    %c0_6 = arith.constant 0 : index
    %c0_7 = arith.constant 0 : index
    %15 = vector.load %arg3[%c0_5, %c0_6, %c0_7] : memref<1x32x96xbf16, #tpu.memory_space<vmem>>, vector<1x32x96xbf16>
    %16 = vector.shape_cast %15 : vector<1x32x96xbf16> to vector<32x96xbf16>
    %cst = arith.constant dense<0.000000e+00> : vector<16x96xf32>
    %17 = tpu.matmul %4, %16, %cst {dimension_numbers = #tpu.dot_dimension_numbers<[1], [0], [0], [1], [0, 0, 1, 1], [], []>} : vector<16x32xbf16>, vector<32x96xbf16>, vector<16x96xf32> -> vector<16x96xf32>
    %18 = vector.broadcast %7 : vector<1x96xf32> to vector<16x96xf32>
    %19 = arith.addf %17, %18 : vector<16x96xf32>
    %20 = vector.extract_strided_slice %19 {offsets = [0, 0], sizes = [16, 32], strides = [1, 1]} : vector<16x96xf32> to vector<16x32xf32>
    %cst_8 = arith.constant 0.353553385 : f32
    %21 = vector.broadcast %cst_8 : f32 to vector<16x32xf32>
    %22 = arith.mulf %20, %21 : vector<16x32xf32>
    %23 = arith.truncf %22 : vector<16x32xf32> to vector<16x32xbf16>
    %24 = vector.extract_strided_slice %19 {offsets = [0, 32], sizes = [16, 32], strides = [1, 1]} : vector<16x96xf32> to vector<16x32xf32>
    %25 = arith.truncf %24 : vector<16x32xf32> to vector<16x32xbf16>
    %26 = vector.extract_strided_slice %19 {offsets = [0, 64], sizes = [16, 32], strides = [1, 1]} : vector<16x96xf32> to vector<16x32xf32>
    %27 = arith.truncf %26 : vector<16x32xf32> to vector<16x32xbf16>
    %c0_9 = arith.constant 0 : index
    %c0_10 = arith.constant 0 : index
    %c0_11 = arith.constant 0 : index
    %28 = vector.load %arg4[%c0_9, %c0_10, %c0_11] : memref<1x32x32xbf16, #tpu.memory_space<vmem>>, vector<1x32x32xbf16>
    %29 = vector.shape_cast %28 : vector<1x32x32xbf16> to vector<32x32xbf16>
    %cst_12 = arith.constant 0.000000e+00 : f32
    %30 = vector.broadcast %cst_12 : f32 to vector<16x32xf32>
    %31 = vector.extract_strided_slice %23 {offsets = [0, 0], sizes = [16, 8], strides = [1, 1]} : vector<16x32xbf16> to vector<16x8xbf16>
    %32 = vector.shape_cast %31 : vector<16x8xbf16> to vector<1x16x8xbf16>
    %33 = vector.extract_strided_slice %25 {offsets = [0, 0], sizes = [16, 8], strides = [1, 1]} : vector<16x32xbf16> to vector<16x8xbf16>
    %34 = vector.shape_cast %33 : vector<16x8xbf16> to vector<1x16x8xbf16>
    %35 = vector.extract_strided_slice %27 {offsets = [0, 0], sizes = [16, 8], strides = [1, 1]} : vector<16x32xbf16> to vector<16x8xbf16>
    %36 = vector.shape_cast %35 : vector<16x8xbf16> to vector<1x16x8xbf16>
    "tpu.trace_start"() <{level = 10 : i32, message = "bqd,bkd->bqk"}> : () -> ()
    %cst_13 = arith.constant dense<0.000000e+00> : vector<1x16x16xf32>
    %37 = tpu.matmul %32, %34, %cst_13 {dimension_numbers = #tpu.dot_dimension_numbers<[2], [2], [1], [1], [0, 0, 0, 1, 1, 1], [0], [0]>} : vector<1x16x8xbf16>, vector<1x16x8xbf16>, vector<1x16x16xf32> -> vector<1x16x16xf32>
    "tpu.trace_stop"() : () -> ()
    %cst_14 = arith.constant dense<0xFF800000> : vector<1x16xf32>
    %38 = vector.multi_reduction <maximumf>, %37, %cst_14 [2] : vector<1x16x16xf32> to vector<1x16xf32>
    %39 = vector.shape_cast %38 : vector<1x16xf32> to vector<1x16x1xf32>
    %40 = vector.broadcast %39 : vector<1x16x1xf32> to vector<1x16x16xf32>
    %41 = arith.subf %37, %40 : vector<1x16x16xf32>
    %42 = math.exp %41 : vector<1x16x16xf32>
    %cst_15 = arith.constant dense<0.000000e+00> : vector<1x16xf32>
    %43 = vector.multi_reduction <add>, %42, %cst_15 [2] : vector<1x16x16xf32> to vector<1x16xf32>
    %44 = vector.shape_cast %43 : vector<1x16xf32> to vector<1x16x1xf32>
    %45 = tpu.reciprocal %44 {approx = true} : vector<1x16x1xf32> -> vector<1x16x1xf32>
    %46 = vector.broadcast %45 : vector<1x16x1xf32> to vector<1x16x16xf32>
    %47 = arith.mulf %42, %46 : vector<1x16x16xf32>
    %48 = arith.truncf %47 : vector<1x16x16xf32> to vector<1x16x16xbf16>
    "tpu.trace_start"() <{level = 10 : i32, message = "bqk,bkd->bqd"}> : () -> ()
    %cst_16 = arith.constant dense<0.000000e+00> : vector<1x16x8xf32>
    %49 = tpu.matmul %48, %36, %cst_16 {dimension_numbers = #tpu.dot_dimension_numbers<[2], [1], [1], [2], [0, 0, 0, 1, 1, 2], [0], [0]>} : vector<1x16x16xbf16>, vector<1x16x8xbf16>, vector<1x16x8xf32> -> vector<1x16x8xf32>
    "tpu.trace_stop"() : () -> ()
    %50 = vector.shape_cast %49 : vector<1x16x8xf32> to vector<16x8xf32>
    %51 = arith.truncf %50 : vector<16x8xf32> to vector<16x8xbf16>
    %52 = vector.extract_strided_slice %29 {offsets = [0, 0], sizes = [8, 32], strides = [1, 1]} : vector<32x32xbf16> to vector<8x32xbf16>
    %cst_17 = arith.constant dense<0.000000e+00> : vector<16x32xf32>
    %53 = tpu.matmul %51, %52, %cst_17 {dimension_numbers = #tpu.dot_dimension_numbers<[1], [0], [0], [1], [0, 0, 1, 1], [], []>} : vector<16x8xbf16>, vector<8x32xbf16>, vector<16x32xf32> -> vector<16x32xf32>
    %54 = arith.addf %30, %53 : vector<16x32xf32>
    %55 = vector.extract_strided_slice %23 {offsets = [0, 8], sizes = [16, 8], strides = [1, 1]} : vector<16x32xbf16> to vector<16x8xbf16>
    %56 = vector.shape_cast %55 : vector<16x8xbf16> to vector<1x16x8xbf16>
    %57 = vector.extract_strided_slice %25 {offsets = [0, 8], sizes = [16, 8], strides = [1, 1]} : vector<16x32xbf16> to vector<16x8xbf16>
    %58 = vector.shape_cast %57 : vector<16x8xbf16> to vector<1x16x8xbf16>
    %59 = vector.extract_strided_slice %27 {offsets = [0, 8], sizes = [16, 8], strides = [1, 1]} : vector<16x32xbf16> to vector<16x8xbf16>
    %60 = vector.shape_cast %59 : vector<16x8xbf16> to vector<1x16x8xbf16>
    "tpu.trace_start"() <{level = 10 : i32, message = "bqd,bkd->bqk"}> : () -> ()
    %cst_18 = arith.constant dense<0.000000e+00> : vector<1x16x16xf32>
    %61 = tpu.matmul %56, %58, %cst_18 {dimension_numbers = #tpu.dot_dimension_numbers<[2], [2], [1], [1], [0, 0, 0, 1, 1, 1], [0], [0]>} : vector<1x16x8xbf16>, vector<1x16x8xbf16>, vector<1x16x16xf32> -> vector<1x16x16xf32>
    "tpu.trace_stop"() : () -> ()
    %cst_19 = arith.constant dense<0xFF800000> : vector<1x16xf32>
    %62 = vector.multi_reduction <maximumf>, %61, %cst_19 [2] : vector<1x16x16xf32> to vector<1x16xf32>
    %63 = vector.shape_cast %62 : vector<1x16xf32> to vector<1x16x1xf32>
    %64 = vector.broadcast %63 : vector<1x16x1xf32> to vector<1x16x16xf32>
    %65 = arith.subf %61, %64 : vector<1x16x16xf32>
    %66 = math.exp %65 : vector<1x16x16xf32>
    %cst_20 = arith.constant dense<0.000000e+00> : vector<1x16xf32>
    %67 = vector.multi_reduction <add>, %66, %cst_20 [2] : vector<1x16x16xf32> to vector<1x16xf32>
    %68 = vector.shape_cast %67 : vector<1x16xf32> to vector<1x16x1xf32>
    %69 = tpu.reciprocal %68 {approx = true} : vector<1x16x1xf32> -> vector<1x16x1xf32>
    %70 = vector.broadcast %69 : vector<1x16x1xf32> to vector<1x16x16xf32>
    %71 = arith.mulf %66, %70 : vector<1x16x16xf32>
    %72 = arith.truncf %71 : vector<1x16x16xf32> to vector<1x16x16xbf16>
    "tpu.trace_start"() <{level = 10 : i32, message = "bqk,bkd->bqd"}> : () -> ()
    %cst_21 = arith.constant dense<0.000000e+00> : vector<1x16x8xf32>
    %73 = tpu.matmul %72, %60, %cst_21 {dimension_numbers = #tpu.dot_dimension_numbers<[2], [1], [1], [2], [0, 0, 0, 1, 1, 2], [0], [0]>} : vector<1x16x16xbf16>, vector<1x16x8xbf16>, vector<1x16x8xf32> -> vector<1x16x8xf32>
    "tpu.trace_stop"() : () -> ()
    %74 = vector.shape_cast %73 : vector<1x16x8xf32> to vector<16x8xf32>
    %75 = arith.truncf %74 : vector<16x8xf32> to vector<16x8xbf16>
    %76 = vector.extract_strided_slice %29 {offsets = [8, 0], sizes = [8, 32], strides = [1, 1]} : vector<32x32xbf16> to vector<8x32xbf16>
    %cst_22 = arith.constant dense<0.000000e+00> : vector<16x32xf32>
    %77 = tpu.matmul %75, %76, %cst_22 {dimension_numbers = #tpu.dot_dimension_numbers<[1], [0], [0], [1], [0, 0, 1, 1], [], []>} : vector<16x8xbf16>, vector<8x32xbf16>, vector<16x32xf32> -> vector<16x32xf32>
    %78 = arith.addf %54, %77 : vector<16x32xf32>
    %79 = vector.extract_strided_slice %23 {offsets = [0, 16], sizes = [16, 8], strides = [1, 1]} : vector<16x32xbf16> to vector<16x8xbf16>
    %80 = vector.shape_cast %79 : vector<16x8xbf16> to vector<1x16x8xbf16>
    %81 = vector.extract_strided_slice %25 {offsets = [0, 16], sizes = [16, 8], strides = [1, 1]} : vector<16x32xbf16> to vector<16x8xbf16>
    %82 = vector.shape_cast %81 : vector<16x8xbf16> to vector<1x16x8xbf16>
    %83 = vector.extract_strided_slice %27 {offsets = [0, 16], sizes = [16, 8], strides = [1, 1]} : vector<16x32xbf16> to vector<16x8xbf16>
    %84 = vector.shape_cast %83 : vector<16x8xbf16> to vector<1x16x8xbf16>
    "tpu.trace_start"() <{level = 10 : i32, message = "bqd,bkd->bqk"}> : () -> ()
    %cst_23 = arith.constant dense<0.000000e+00> : vector<1x16x16xf32>
    %85 = tpu.matmul %80, %82, %cst_23 {dimension_numbers = #tpu.dot_dimension_numbers<[2], [2], [1], [1], [0, 0, 0, 1, 1, 1], [0], [0]>} : vector<1x16x8xbf16>, vector<1x16x8xbf16>, vector<1x16x16xf32> -> vector<1x16x16xf32>
    "tpu.trace_stop"() : () -> ()
    %cst_24 = arith.constant dense<0xFF800000> : vector<1x16xf32>
    %86 = vector.multi_reduction <maximumf>, %85, %cst_24 [2] : vector<1x16x16xf32> to vector<1x16xf32>
    %87 = vector.shape_cast %86 : vector<1x16xf32> to vector<1x16x1xf32>
    %88 = vector.broadcast %87 : vector<1x16x1xf32> to vector<1x16x16xf32>
    %89 = arith.subf %85, %88 : vector<1x16x16xf32>
    %90 = math.exp %89 : vector<1x16x16xf32>
    %cst_25 = arith.constant dense<0.000000e+00> : vector<1x16xf32>
    %91 = vector.multi_reduction <add>, %90, %cst_25 [2] : vector<1x16x16xf32> to vector<1x16xf32>
    %92 = vector.shape_cast %91 : vector<1x16xf32> to vector<1x16x1xf32>
    %93 = tpu.reciprocal %92 {approx = true} : vector<1x16x1xf32> -> vector<1x16x1xf32>
    %94 = vector.broadcast %93 : vector<1x16x1xf32> to vector<1x16x16xf32>
    %95 = arith.mulf %90, %94 : vector<1x16x16xf32>
    %96 = arith.truncf %95 : vector<1x16x16xf32> to vector<1x16x16xbf16>
    "tpu.trace_start"() <{level = 10 : i32, message = "bqk,bkd->bqd"}> : () -> ()
    %cst_26 = arith.constant dense<0.000000e+00> : vector<1x16x8xf32>
    %97 = tpu.matmul %96, %84, %cst_26 {dimension_numbers = #tpu.dot_dimension_numbers<[2], [1], [1], [2], [0, 0, 0, 1, 1, 2], [0], [0]>} : vector<1x16x16xbf16>, vector<1x16x8xbf16>, vector<1x16x8xf32> -> vector<1x16x8xf32>
    "tpu.trace_stop"() : () -> ()
    %98 = vector.shape_cast %97 : vector<1x16x8xf32> to vector<16x8xf32>
    %99 = arith.truncf %98 : vector<16x8xf32> to vector<16x8xbf16>
    %100 = vector.extract_strided_slice %29 {offsets = [16, 0], sizes = [8, 32], strides = [1, 1]} : vector<32x32xbf16> to vector<8x32xbf16>
    %cst_27 = arith.constant dense<0.000000e+00> : vector<16x32xf32>
    %101 = tpu.matmul %99, %100, %cst_27 {dimension_numbers = #tpu.dot_dimension_numbers<[1], [0], [0], [1], [0, 0, 1, 1], [], []>} : vector<16x8xbf16>, vector<8x32xbf16>, vector<16x32xf32> -> vector<16x32xf32>
    %102 = arith.addf %78, %101 : vector<16x32xf32>
    %103 = vector.extract_strided_slice %23 {offsets = [0, 24], sizes = [16, 8], strides = [1, 1]} : vector<16x32xbf16> to vector<16x8xbf16>
    %104 = vector.shape_cast %103 : vector<16x8xbf16> to vector<1x16x8xbf16>
    %105 = vector.extract_strided_slice %25 {offsets = [0, 24], sizes = [16, 8], strides = [1, 1]} : vector<16x32xbf16> to vector<16x8xbf16>
    %106 = vector.shape_cast %105 : vector<16x8xbf16> to vector<1x16x8xbf16>
    %107 = vector.extract_strided_slice %27 {offsets = [0, 24], sizes = [16, 8], strides = [1, 1]} : vector<16x32xbf16> to vector<16x8xbf16>
    %108 = vector.shape_cast %107 : vector<16x8xbf16> to vector<1x16x8xbf16>
    "tpu.trace_start"() <{level = 10 : i32, message = "bqd,bkd->bqk"}> : () -> ()
    %cst_28 = arith.constant dense<0.000000e+00> : vector<1x16x16xf32>
    %109 = tpu.matmul %104, %106, %cst_28 {dimension_numbers = #tpu.dot_dimension_numbers<[2], [2], [1], [1], [0, 0, 0, 1, 1, 1], [0], [0]>} : vector<1x16x8xbf16>, vector<1x16x8xbf16>, vector<1x16x16xf32> -> vector<1x16x16xf32>
    "tpu.trace_stop"() : () -> ()
    %cst_29 = arith.constant dense<0xFF800000> : vector<1x16xf32>
    %110 = vector.multi_reduction <maximumf>, %109, %cst_29 [2] : vector<1x16x16xf32> to vector<1x16xf32>
    %111 = vector.shape_cast %110 : vector<1x16xf32> to vector<1x16x1xf32>
    %112 = vector.broadcast %111 : vector<1x16x1xf32> to vector<1x16x16xf32>
    %113 = arith.subf %109, %112 : vector<1x16x16xf32>
    %114 = math.exp %113 : vector<1x16x16xf32>
    %cst_30 = arith.constant dense<0.000000e+00> : vector<1x16xf32>
    %115 = vector.multi_reduction <add>, %114, %cst_30 [2] : vector<1x16x16xf32> to vector<1x16xf32>
    %116 = vector.shape_cast %115 : vector<1x16xf32> to vector<1x16x1xf32>
    %117 = tpu.reciprocal %116 {approx = true} : vector<1x16x1xf32> -> vector<1x16x1xf32>
    %118 = vector.broadcast %117 : vector<1x16x1xf32> to vector<1x16x16xf32>
    %119 = arith.mulf %114, %118 : vector<1x16x16xf32>
    %120 = arith.truncf %119 : vector<1x16x16xf32> to vector<1x16x16xbf16>
    "tpu.trace_start"() <{level = 10 : i32, message = "bqk,bkd->bqd"}> : () -> ()
    %cst_31 = arith.constant dense<0.000000e+00> : vector<1x16x8xf32>
    %121 = tpu.matmul %120, %108, %cst_31 {dimension_numbers = #tpu.dot_dimension_numbers<[2], [1], [1], [2], [0, 0, 0, 1, 1, 2], [0], [0]>} : vector<1x16x16xbf16>, vector<1x16x8xbf16>, vector<1x16x8xf32> -> vector<1x16x8xf32>
    "tpu.trace_stop"() : () -> ()
    %122 = vector.shape_cast %121 : vector<1x16x8xf32> to vector<16x8xf32>
    %123 = arith.truncf %122 : vector<16x8xf32> to vector<16x8xbf16>
    %124 = vector.extract_strided_slice %29 {offsets = [24, 0], sizes = [8, 32], strides = [1, 1]} : vector<32x32xbf16> to vector<8x32xbf16>
    %cst_32 = arith.constant dense<0.000000e+00> : vector<16x32xf32>
    %125 = tpu.matmul %123, %124, %cst_32 {dimension_numbers = #tpu.dot_dimension_numbers<[1], [0], [0], [1], [0, 0, 1, 1], [], []>} : vector<16x8xbf16>, vector<8x32xbf16>, vector<16x32xf32> -> vector<16x32xf32>
    %126 = arith.addf %102, %125 : vector<16x32xf32>
    %127 = vector.broadcast %8 : vector<1x32xf32> to vector<16x32xf32>
    %128 = arith.addf %126, %127 : vector<16x32xf32>
    %129 = arith.addf %128, %3 : vector<16x32xf32>
    %cst_33 = arith.constant dense<0.000000e+00> : vector<16xf32>
    %130 = vector.multi_reduction <add>, %129, %cst_33 [1] : vector<16x32xf32> to vector<16xf32>
    %131 = vector.shape_cast %130 : vector<16xf32> to vector<16x1xf32>
    %cst_34 = arith.constant 3.200000e+01 : f32
    %132 = vector.broadcast %cst_34 : f32 to vector<16x1xf32>
    %133 = arith.divf %131, %132 : vector<16x1xf32>
    %134 = vector.broadcast %133 : vector<16x1xf32> to vector<16x32xf32>
    %135 = arith.subf %129, %134 : vector<16x32xf32>
    %136 = arith.mulf %135, %135 : vector<16x32xf32>
    %cst_35 = arith.constant dense<0.000000e+00> : vector<16xf32>
    %137 = vector.multi_reduction <add>, %136, %cst_35 [1] : vector<16x32xf32> to vector<16xf32>
    %138 = vector.shape_cast %137 : vector<16xf32> to vector<16x1xf32>
    %cst_36 = arith.constant 3.200000e+01 : f32
    %139 = vector.broadcast %cst_36 : f32 to vector<16x1xf32>
    %140 = arith.divf %138, %139 : vector<16x1xf32>
    %cst_37 = arith.constant 9.99999996E-13 : f32
    %141 = vector.broadcast %cst_37 : f32 to vector<16x1xf32>
    %142 = arith.addf %140, %141 : vector<16x1xf32>
    %143 = math.rsqrt %142 : vector<16x1xf32>
    %144 = vector.broadcast %143 : vector<16x1xf32> to vector<16x32xf32>
    %145 = arith.mulf %135, %144 : vector<16x32xf32>
    %146 = vector.broadcast %9 : vector<1x32xf32> to vector<16x32xf32>
    %147 = arith.mulf %145, %146 : vector<16x32xf32>
    %148 = vector.broadcast %10 : vector<1x32xf32> to vector<16x32xf32>
    %149 = arith.addf %147, %148 : vector<16x32xf32>
    %150 = arith.truncf %149 : vector<16x32xf32> to vector<16x32xbf16>
    %c0_38 = arith.constant 0 : index
    %c0_39 = arith.constant 0 : index
    %c0_40 = arith.constant 0 : index
    %151 = vector.load %arg5[%c0_38, %c0_39, %c0_40] : memref<1x32x64xbf16, #tpu.memory_space<vmem>>, vector<1x32x64xbf16>
    %152 = vector.shape_cast %151 : vector<1x32x64xbf16> to vector<32x64xbf16>
    %cst_41 = arith.constant dense<0.000000e+00> : vector<16x64xf32>
    %153 = tpu.matmul %150, %152, %cst_41 {dimension_numbers = #tpu.dot_dimension_numbers<[1], [0], [0], [1], [0, 0, 1, 1], [], []>} : vector<16x32xbf16>, vector<32x64xbf16>, vector<16x64xf32> -> vector<16x64xf32>
    %154 = vector.broadcast %11 : vector<1x64xf32> to vector<16x64xf32>
    %155 = arith.addf %153, %154 : vector<16x64xf32>
    %cst_42 = arith.constant 5.000000e-01 : f32
    %156 = vector.broadcast %cst_42 : f32 to vector<16x64xf32>
    %157 = arith.mulf %156, %155 : vector<16x64xf32>
    %cst_43 = arith.constant 4.471500e-02 : f32
    %158 = vector.broadcast %cst_43 : f32 to vector<16x64xf32>
    %159 = arith.mulf %158, %155 : vector<16x64xf32>
    %160 = arith.mulf %159, %155 : vector<16x64xf32>
    %161 = arith.mulf %160, %155 : vector<16x64xf32>
    %162 = arith.addf %155, %161 : vector<16x64xf32>
    %cst_44 = arith.constant 0.797884583 : f32
    %163 = vector.broadcast %cst_44 : f32 to vector<16x64xf32>
    %164 = arith.mulf %163, %162 : vector<16x64xf32>
    %165 = math.tanh %164 : vector<16x64xf32>
    %cst_45 = arith.constant 1.000000e+00 : f32
    %166 = vector.broadcast %cst_45 : f32 to vector<16x64xf32>
    %167 = arith.addf %166, %165 : vector<16x64xf32>
    %168 = arith.mulf %157, %167 : vector<16x64xf32>
    %169 = arith.truncf %168 : vector<16x64xf32> to vector<16x64xbf16>
    %c0_46 = arith.constant 0 : index
    %c0_47 = arith.constant 0 : index
    %c0_48 = arith.constant 0 : index
    %170 = vector.load %arg6[%c0_46, %c0_47, %c0_48] : memref<1x64x32xbf16, #tpu.memory_space<vmem>>, vector<1x64x32xbf16>
    %171 = vector.shape_cast %170 : vector<1x64x32xbf16> to vector<64x32xbf16>
    %cst_49 = arith.constant dense<0.000000e+00> : vector<16x32xf32>
    %172 = tpu.matmul %169, %171, %cst_49 {dimension_numbers = #tpu.dot_dimension_numbers<[1], [0], [0], [1], [0, 0, 1, 1], [], []>} : vector<16x64xbf16>, vector<64x32xbf16>, vector<16x32xf32> -> vector<16x32xf32>
    %173 = vector.broadcast %12 : vector<1x32xf32> to vector<16x32xf32>
    %174 = arith.addf %172, %173 : vector<16x32xf32>
    %175 = arith.addf %174, %149 : vector<16x32xf32>
    %cst_50 = arith.constant dense<0.000000e+00> : vector<16xf32>
    %176 = vector.multi_reduction <add>, %175, %cst_50 [1] : vector<16x32xf32> to vector<16xf32>
    %177 = vector.shape_cast %176 : vector<16xf32> to vector<16x1xf32>
    %cst_51 = arith.constant 3.200000e+01 : f32
    %178 = vector.broadcast %cst_51 : f32 to vector<16x1xf32>
    %179 = arith.divf %177, %178 : vector<16x1xf32>
    %180 = vector.broadcast %179 : vector<16x1xf32> to vector<16x32xf32>
    %181 = arith.subf %175, %180 : vector<16x32xf32>
    %182 = arith.mulf %181, %181 : vector<16x32xf32>
    %cst_52 = arith.constant dense<0.000000e+00> : vector<16xf32>
    %183 = vector.multi_reduction <add>, %182, %cst_52 [1] : vector<16x32xf32> to vector<16xf32>
    %184 = vector.shape_cast %183 : vector<16xf32> to vector<16x1xf32>
    %cst_53 = arith.constant 3.200000e+01 : f32
    %185 = vector.broadcast %cst_53 : f32 to vector<16x1xf32>
    %186 = arith.divf %184, %185 : vector<16x1xf32>
    %cst_54 = arith.constant 9.99999996E-13 : f32
    %187 = vector.broadcast %cst_54 : f32 to vector<16x1xf32>
    %188 = arith.addf %186, %187 : vector<16x1xf32>
    %189 = math.rsqrt %188 : vector<16x1xf32>
    %190 = vector.broadcast %189 : vector<16x1xf32> to vector<16x32xf32>
    %191 = arith.mulf %181, %190 : vector<16x32xf32>
    %192 = vector.broadcast %13 : vector<1x32xf32> to vector<16x32xf32>
    %193 = arith.mulf %191, %192 : vector<16x32xf32>
    %194 = vector.broadcast %14 : vector<1x32xf32> to vector<16x32xf32>
    %195 = arith.addf %193, %194 : vector<16x32xf32>
    %c0_55 = arith.constant 0 : index
    %c0_56 = arith.constant 0 : index
    %196 = vector.load %arg11[%c0_55, %c0_56] : memref<16x32xf32, #tpu.memory_space<vmem>>, vector<16x32xf32>
    tpu.vector_store %arg11[%c0_55, %c0_56], %195 {strides = array<i32>} : memref<16x32xf32, #tpu.memory_space<vmem>>, vector<16x32xf32>,
    %c1_i32 = arith.constant 1 : i32
    %197 = arith.cmpi eq, %arg1, %c1_i32 : i32
    %198 = arith.extui %197 : i1 to i32
    %c0_i32_57 = arith.constant 0 : i32
    %199 = arith.cmpi ne, %198, %c0_i32_57 : i32
    scf.if %199 {
      %200 = vector.shape_cast %195 : vector<16x32xf32> to vector<1x16x32xf32>
      %201 = vector.extract_strided_slice %200 {offsets = [0, 0, 0], sizes = [1, 1, 32], strides = [1, 1, 1]} : vector<1x16x32xf32> to vector<1x1x32xf32>
      %202 = vector.shape_cast %201 : vector<1x1x32xf32> to vector<1x32xf32>
      %203 = arith.truncf %202 : vector<1x32xf32> to vector<1x32xbf16>
      %c0_58 = arith.constant 0 : index
      %c0_59 = arith.constant 0 : index
      %204 = vector.load %arg8[%c0_58, %c0_59] : memref<32x32xbf16, #tpu.memory_space<vmem>>, vector<32x32xbf16>
      %cst_60 = arith.constant dense<0.000000e+00> : vector<1x32xf32>
      %205 = tpu.matmul %203, %204, %cst_60 {dimension_numbers = #tpu.dot_dimension_numbers<[1], [0], [0], [1], [0, 0, 1, 1], [], []>} : vector<1x32xbf16>, vector<32x32xbf16>, vector<1x32xf32> -> vector<1x32xf32>
      %c2 = arith.constant 2 : index
      %c0_61 = arith.constant 0 : index
      %206 = vector.load %arg9[%c2, %c0_61] : memref<3x32xf32, #tpu.memory_space<vmem>>, vector<1x32xf32>
      %207 = arith.addf %205, %206 : vector<1x32xf32>
      %208 = math.tanh %207 : vector<1x32xf32>
      %209 = vector.shape_cast %208 : vector<1x32xf32> to vector<1x1x32xf32>
      %c0_62 = arith.constant 0 : index
      %c0_63 = arith.constant 0 : index
      %c0_64 = arith.constant 0 : index
      %210 = vector.load %arg10[%c0_62, %c0_63, %c0_64] : memref<1x1x32xf32, #tpu.memory_space<vmem>>, vector<1x1x32xf32>
      tpu.vector_store %arg10[%c0_62, %c0_63, %c0_64], %209 {strides = array<i32>} : memref<1x1x32xf32, #tpu.memory_space<vmem>>, vector<1x1x32xf32>,
    } else {
    }
    return
  }
  func.func @transform_1(%arg0: i32, %arg1: i32) -> (i32, i32, i32) {
    %c0_i32 = arith.constant 0 : i32
    %c0_i32_0 = arith.constant 0 : i32
    %c0_i32_1 = arith.constant 0 : i32
    return %arg1, %c0_i32, %c0_i32_0 : i32, i32, i32
  }
  func.func @transform_2(%arg0: i32, %arg1: i32) -> (i32, i32, i32) {
    %c0_i32 = arith.constant 0 : i32
    %c0_i32_0 = arith.constant 0 : i32
    %c0_i32_1 = arith.constant 0 : i32
    return %arg1, %c0_i32, %c0_i32_0 : i32, i32, i32
  }
  func.func @transform_3(%arg0: i32, %arg1: i32) -> (i32, i32, i32) {
    %c0_i32 = arith.constant 0 : i32
    %c0_i32_0 = arith.constant 0 : i32
    %c0_i32_1 = arith.constant 0 : i32
    return %arg1, %c0_i32, %c0_i32_0 : i32, i32, i32
  }
  func.func @transform_4(%arg0: i32, %arg1: i32) -> (i32, i32, i32) {
    %c0_i32 = arith.constant 0 : i32
    %c0_i32_0 = arith.constant 0 : i32
    %c0_i32_1 = arith.constant 0 : i32
    return %arg1, %c0_i32, %c0_i32_0 : i32, i32, i32
  }
  func.func @transform_5(%arg0: i32, %arg1: i32) -> (i32, i32, i32) {
    %c0_i32 = arith.constant 0 : i32
    %c0_i32_0 = arith.constant 0 : i32
    %c0_i32_1 = arith.constant 0 : i32
    return %arg1, %c0_i32, %c0_i32_0 : i32, i32, i32
  }
  func.func @transform_6(%arg0: i32, %arg1: i32) -> (i32, i32) {
    %c0_i32 = arith.constant 0 : i32
    %c0_i32_0 = arith.constant 0 : i32
    %c0_i32_1 = arith.constant 0 : i32
    return %c0_i32, %c0_i32_0 : i32, i32
  }
  func.func @transform_7(%arg0: i32, %arg1: i32) -> (i32, i32) {
    %c0_i32 = arith.constant 0 : i32
    %c0_i32_0 = arith.constant 0 : i32
    %c0_i32_1 = arith.constant 0 : i32
    return %c0_i32, %c0_i32_0 : i32, i32
  }
  func.func @transform_8(%arg0: i32, %arg1: i32) -> (i32, i32, i32) {
    %c0_i32 = arith.constant 0 : i32
    %c0_i32_0 = arith.constant 0 : i32
    %c0_i32_1 = arith.constant 0 : i32
    return %arg0, %c0_i32, %c0_i32_0 : i32, i32, i32
  }
}

</mosaic_0001>

<bundles_post_ra>
// kernel: tpu_custom_call.1
= control target key start
LH: loop header
LB: loop body
LE: loop exit
PB: predicated region body
PF: predicated region fallthrough
CT: control target
= control target key end

     0   :  { %s2862_s0 = inlined_call_operand.vmem [shape: f32[32,32], index: 0, kind: input, shape index: {}]   ;;  %s2863_s1 = inlined_call_operand.vmem [shape: bf16[2,32,96], index: 1, kind: input, shape index: {}]   ;;  %s2864_s2 = inlined_call_operand.vmem [shape: bf16[2,32,32], index: 2, kind: input, shape index: {}]   ;;  %s2865_s3 = inlined_call_operand.hbm [shape: bf16[2,32,64], index: 3, kind: input, shape index: {}]   ;;  %s2866_s4 = inlined_call_operand.vmem [shape: bf16[2,64,32], index: 4, kind: input, shape index: {}]   ;;  %s2867_s5 = inlined_call_operand.vmem [shape: f32[2,8,96], index: 5, kind: input, shape index: {}]   ;;  %s2868_s6 = inlined_call_operand.hbm [shape: bf16[32,32], index: 6, kind: input, shape index: {}]   ;;  %s2869_s7 = inlined_call_operand.vmem [shape: f32[3,32], index: 7, kind: input, shape index: {}]   ;;  %s2870_s8 = inlined_call_operand.hbm [shape: f32[2,1,32], index: 8, kind: output, shape index: {}]  }
   0x1   :  { %2890 = sst [smem:[#allocation23_spill]] %s2865_s3 }
   0x2   :  { %2891 = sst [smem:[#allocation24_spill]] %s2868_s6 }
   0x3   :  { %2892 = sst [smem:[#allocation25_spill]] %s2869_s7 }
   0x4   :  { %2893 = sst [smem:[#allocation26_spill]] %s2870_s8 }
   0x5   :  { %13 = vsyncpa [#allocation4], 0 }
   0x6   :  { %15 = vsyncpa [#allocation4 + $0x1], 0 }
   0x7   :  { %16 = vsyncpa [#allocation7], 0 }
   0x8   :  { %17 = vsyncpa [#allocation5], 0 }
   0x9   :  { %19 = vsyncpa [#allocation5 + $0x1], 0  ;;  %s2386_s27 = smov 0   ;;  %s2388_s28 = smov 0  }
   0xa   :  { %s2390_s29 = smov 0   ;;  %s2392_s30 = smov 0  }
   0xb   :  { %s2394_s9 = smov 0   ;;  %s2396_s10 = smov 0  }
   0xc   :  { %s2398_s11 = smov 0   ;;  %s2400_s12 = smov 0  }
   0xd   :  { %s2402_s13 = smov 0   ;;  %s2404_s14 = smov 0  }
   0xe   :  { %s2406_s15 = smov 0  }
   0xf LB: > { %2894 = sst [smem:[#allocation15_spill]] %s2279_s27  ;;  %s1741_s16 = sadd.s32 4294967295, %s2319_s15   ;;  %s2319_s15 = sphi %s2406_s15, %s25_s15   ;;  %s2315_s14 = sphi %s2404_s14, %s2935_s14   ;;  %s2311_s13 = sphi %s2402_s13, %s2934_s13   ;;  %s2307_s12 = sphi %s2400_s12, %s2933_s12   ;;  %s2303_s11 = sphi %s2398_s11, %s2932_s11   ;;  %s2299_s10 = sphi %s2396_s10, %s2941_s10   ;;  %s2295_s9 = sphi %s2394_s9, %s2940_s9   ;;  %s2291_s30 = sphi %s2392_s30, %s2939_s30   ;;  %s2287_s29 = sphi %s2390_s29, %s2938_s29   ;;  %s2283_s28 = sphi %s2388_s28, %s2937_s28   ;;  %s2279_s27 = sphi %s2386_s27, %s2936_s27  }
  0x10   : > { %2895 = sst [smem:[#allocation16_spill]] %s2311_s13  ;;  %s1742_s17 = sadd.s32 4294967294, %s2319_s15  }
  0x11   : > { %2896 = sst [smem:[#allocation17_spill]] %s2315_s14  ;;  %p109_p0 = scmp.ne.s32.totalorder %s2295_s9, %s2291_s30 }
  0x12   : > { %2897 = sst [smem:[#allocation18_spill]] %s2319_s15  ;;  %p2442_p1 = scmp.eq.s32.totalorder %s1741_s16, 0 }
  0x13   : > { %p226_p2 = scmp.ne.s32.totalorder %s2287_s29, %s2283_s28  ;;  %p227_p4 = scmp.eq.s32.totalorder %s1741_s16, 3 }
  0x14   : > { %s2898_s18 = scalar_select %p2442_p1, 1, 0 }
  0x15   : > { %p2451_p3 = por %p2442_p1, %p109_p0  ;;  %p232_p5 = scmp.ne.s32.totalorder %s2283_s28, %s2279_s27 }
  0x16   : > { %p233_p6 = scmp.eq.s32.totalorder %s1742_s17, 3  ;;  %p2457_p7 = por %p227_p4, %p226_p2 }
  0x17   : > { %s2899_s20 = scalar_select %p2451_p3, 1, 0 }
  0x18   : > { %s2900_s21 = scalar_select %p2457_p7, 1, 0 }
  0x19   : > { %p1743_p8 = scmp.ge.s32.totalorder %s2319_s15, 1  ;;  %p2462_p9 = por %p233_p6, %p232_p5 }
  0x1a   : > { %2901 = sst [smem:[#allocation19_spill]] %s2900_s21  ;;  %p240_p10 = scmp.lt.s32.totalorder %s2319_s15, 5 }
  0x1b   : > { %s2902_s22 = scalar_select %p2462_p9, 1, 0 }
  0x1c   : > { %p2467_p11 = pnand %p1743_p8, %p240_p10  ;;  %s2321_s24 = smov [#allocation6]  }
  0x1d   : > { %2903 = sst [smem:[#allocation20_spill]] %s2902_s22  ;;  %s252_s25 = sshll.u32 %s2321_s24, 4  ;;  %s253_s25 = int_to_ptr.vmem [resolvable:$true] %s252_s25 }
  0x1e   : > { %s2904_s23 = scalar_select %p2467_p11, 1, 0 }
  0x1f   : > { %p1951_p12 = pneg %p2467_p11  ;;  %s2906_s6 = sld [smem:[#allocation24_spill]] }
  0x21   : > { %p2475_p13 = pnand %p1951_p12, %p2442_p1 }
  0x23   : > { %p2135_p2 = pneg %p2475_p13 }
  0x25   : > { %s2133_s17 = scalar_lea.hbm %s2906_s6, 256 }
  0x26   : > { %p2134_p0 = scmp.ne.s32.totalorder %s2906_s6, %s2133_s17  ;;  %p2140_p6 = scmp.lt.u32.totalorder %s2133_s17, %s2906_s6 }
  0x28   : > { %p2136_p4 = pnand %p2135_p2, %p2134_p0 }
  0x2a   : > { %p2137_p5 = pneg %p2136_p4 }
  0x2c   : > { %p2142_p8 = pnand %p2140_p6, %p2137_p5 }
  0x2e   : > { %2145 = shalt.err (!%p2142_p8)
}
  0x2f   : > { %s2146_s8 = scalar_lea.vmem %s253_s25, 256  ;;  %p2154_p7 = scmp.lt.s32.totalorder %s253_s25, %s253_s25 }
  0x30   : > { %p2147_p10 = scmp.ne.s32.totalorder %s253_s25, %s2146_s8  ;;  %p2155_p1 = scmp.lt.s32.totalorder %s2146_s8, %s2146_s8 }
  0x32   : > { %p2149_p12 = pnand %p2147_p10, %p2135_p2  ;;  %p2156_p3 = por %p2155_p1, %p2154_p7 }
  0x34   : > { %p2150_p9 = pneg %p2149_p12 }
  0x36   : > { %p2157_p11 = pnand %p2156_p3, %p2150_p9 }
  0x38   : > { %2160 = shalt.err (!%p2157_p11)
}
  0x39   : > { %s2879_s19 = smov 64   ;;  %s2880_s27 = smov 4  }
  0x3a   : > { %1954 = dma.hbm_to_vmem [thread:$0]  (!%p2475_p13), %s2906_s6, 256, %s253_s25, [#allocation7], %s2879_s19, %s2879_s19, %s2880_s27  }
  0x3b   : > { %s34_s30 = sadd.s32 1, %s2311_s13  ;;  %s37_s16 = sadd.s32 1, %s2315_s14 }
  0x3c   : > { %p35_p1 = scmp.ge.s32.totalorder %s34_s30, 2  ;;  %s96_s17 = sadd.s32 1, %s2299_s10 }
  0x3d   : > { %p103_p3 = scmp.ne.s32.totalorder %s2299_s10, %s2295_s9  ;;  %p104_p7 = scmp.eq.s32.totalorder %s2319_s15, 0 }
  0x3e   : > { %s2943_s30 = smov (%p35_p1, %s34_s30), 0  ;;  %s2945_s16 = smov (!%p35_p1, %s37_s16), %s2315_s14 }
  0x3f   : > { %2907 = sst [smem:[#allocation21_spill]] %s2943_s30  ;;  %s93_s26 = ssub.s32 %s2311_s13, %s2943_s30 }
  0x40   : > { %p39_p9 = scmp.ge.s32.totalorder %s2945_s16, 2  ;;  %p94_p11 = scmp.eq.s32.totalorder %s93_s26, 0 }
  0x41   : > { %p2509_p0 = por %p104_p7, %p103_p3  ;;  %p1964_p13 = scmp.lt.s32.totalorder %s2319_s15, 4 }
  0x42   : > { %s2947_s16 = smov (%p39_p9, %s2945_s16), 0  ;;  %s285_s22 = sand.u32 1, %s2299_s10  }
  0x43   : > { %2909 = sst [smem:[#allocation22_spill]] %s2947_s16  ;;  %s213_s8 = ssub.s32 %s2315_s14, %s2947_s16 }
  0x44   : > { %s2517_s24 = scalar_select %p94_p11, %s2299_s10, %s96_s17  }
  0x45   : > { %p214_p2 = scmp.eq.s32.totalorder %s213_s8, 0  ;;  %s1746_s19 = sshll.u32 %s285_s22, 4 }
  0x46   : > { %s1793_s27 = sshll.u32 %s2311_s13, 8  ;;  %s2910_s6 = sadd.s32 1, %s2287_s29 }
  0x47   : > { %s2526_s30 = scalar_select %p214_p2, %s2287_s29, %s2910_s6  }
  0x48   : > { %s2911_s3 = sld [smem:[#allocation23_spill]]  ;;  %s289_s15 = scalar_lea.vmem [#allocation3], %s1746_s19 }
  0x49   : > { %s296_s17 = sshll.u32 %s289_s15, 4  ;;  %p2535_p4 = pnand %p1964_p13, %p2509_p0  ;;  %s2539_s17 = int_to_ptr.vmem [resolvable:$true] %s296_s17 }
  0x4a   : > { %s2541_s6 = scalar_lea.sflag [#allocation4], %s285_s22 }
  0x4b   : > { %p2163_p6 = pneg %p2535_p4 }
  0x4e   : > { %s2531_s7 = scalar_lea.hbm %s2911_s3, %s1793_s27  ;;  %s2166_s27 = scalar_lea.hbm %s2911_s3, 512 }
  0x4f   : > { %s2161_s21 = scalar_lea.hbm %s2531_s7, 256  ;;  %p2167_p12 = scmp.lt.u32.totalorder %s2531_s7, %s2911_s3 }
  0x50   : > { %p2162_p5 = scmp.ne.s32.totalorder %s2531_s7, %s2161_s21  ;;  %p2168_p1 = scmp.lt.u32.totalorder %s2166_s27, %s2161_s21 }
  0x51   : > { %p2170_p7 = scmp.lt.u32.totalorder %s2161_s21, %s2531_s7 }
  0x52   : > { %p2164_p8 = pnand %p2163_p6, %p2162_p5  ;;  %p2169_p3 = por %p2168_p1, %p2167_p12 }
  0x54   : > { %p2165_p10 = pneg %p2164_p8  ;;  %p2171_p9 = por %p2170_p7, %p2169_p3 }
  0x56   : > { %p2172_p11 = pnand %p2171_p9, %p2165_p10 }
  0x58   : > { %2175 = shalt.err (!%p2172_p11)
}
  0x59   : > { %s2176_s22 = scalar_lea.vmem %s2539_s17, 256  ;;  %s2324_s26 = smov [#allocation3]  }
  0x5a   : > { %p2177_p0 = scmp.ne.s32.totalorder %s2539_s17, %s2176_s22  ;;  %s2181_s15 = sshll.u32 %s2324_s26, 4  ;;  %s2182_s15 = int_to_ptr.vmem [resolvable:$false] %s2181_s15 }
  0x5b   : > { %s2183_s19 = scalar_lea.vmem %s2182_s15, 512  ;;  %p2184_p5 = scmp.lt.s32.totalorder %s2539_s17, %s2182_s15 }
  0x5c   : > { %p2179_p13 = pnand %p2177_p0, %p2163_p6  ;;  %p2185_p8 = scmp.lt.s32.totalorder %s2183_s19, %s2176_s22 }
  0x5e   : > { %p2180_p2 = pneg %p2179_p13  ;;  %p2186_p12 = por %p2185_p8, %p2184_p5 }
  0x60   : > { %p2187_p1 = pnand %p2186_p12, %p2180_p2 }
  0x62   : > { %2190 = shalt.err (!%p2187_p1)
}
  0x63   : > { %s2913_s21 = smov 4   ;;  %s2914_s27 = smov 64  }
  0x64   : > { %1958 = dma.hbm_to_vmem [thread:$0]  (!%p2535_p4), %s2531_s7, 256, %s2539_s17, %s2541_s6, %s2914_s27, %s2914_s27, %s2913_s21  }
  0x65   : > { %p2915_p6 = scmp.ne.s32.totalorder %s2904_s23, 0 }
  0x66   : > { %s325_s25 = sand.u32 (!%p2915_p6), 1, %s2295_s9   ;;  %p2916_p10 = scmp.ne.s32.totalorder (!%p2915_p6), %s2899_s20, 0 }
  0x67   : > { %323 = sbr.rel (%p2915_p6) target bundleno = 4415 (0x113f), region = 48  ;;  %s2575_s8 = sshll.u32 (!%p2915_p6), %s325_s25, 4 }
  0x68   : > { %s326_s22 = scalar_lea.sflag (!%p2915_p6), [#allocation4], %s325_s25 }
  0x6e   : > { %2264 = dma.done.wait (%p2916_p10), %s326_s22, 256  }
  0x6f   : > { %2266 = vsyncadd (%p2916_p10), %s326_s22, 4294967040  ;;  %p2917_p3 = scmp.ne.s32.totalorder %s2898_s18, 0 }
  0x71   : > { %2268 = dma.done.wait (%p2917_p3), [#allocation7], 256  }
  0x72   : > { %2270 = vsyncadd (%p2917_p3), [#allocation7], 4294967040  ;;  %p382_p4 = scmp.lt.s32.totalorder %s2303_s11, 1  ;;  %s2918_s13 = sand.u32 1, %s2283_s28  }
  0x73   : > { %s2611_s6 = scalar_lea.vmem [#allocation8], %s2918_s13  ;;  %p1759_p7 = scmp.ne.s32.totalorder %s2303_s11, 0 }
  0x74   : > { %s383_s23 = scalar_select %p382_p4, %s2303_s11, 1 }
  0x75   : > { %405 = sbr.rel (%p1759_p7) target bundleno = 452 (0x1c4), region = 60 }
  0x76   : > { %s1794_s16 = sshll.u32 %s383_s23, 4  ;;  %s1796_s17 = sshll.u32 %s383_s23, 5 }
  0x77   : > { %s2592_s20 = scalar_lea.vmem %s2863_s1, %s1794_s16  ;;  %s2597_s27 = scalar_lea.vmem %s2864_s2, %s1794_s16 }
  0x78   : > { %s2602_s22 = scalar_lea.vmem %s2866_s4, %s1796_s17  ;;  %s1758_s26 = sshll.u32 %s383_s23, 3 }
  0x79   : > { %s2607_s14 = scalar_lea.vmem %s2867_s5, %s1758_s26  ;;  %s1760_s16 = sshll.u32 (!%p1759_p7), %s2307_s12, 4 }
  0x7c   : > { %s407_s21 = scalar_lea.vmem %s2862_s0, %s1760_s16 }
  0x7d   : > { %v440_v0 = vld [vmem:[%s407_s21] sm:$0xff]  ;;  %v442_v1 = vld [vmem:[%s407_s21 + $0x8] sm:$0xff] }
  0x7e   : > { %441 = vst [vmem:[#allocation2] sm:$0xff] %v440_v0  ;;  %443 = vst [vmem:[#allocation2 + $0x8] sm:$0xff] %v442_v1 }
  0x7f   : > { %451 = vsyncadd [#allocation9], 256 }
  0x80   : > { %2271 = dma.done.wait [#allocation9], 256 }
  0x81   : > { %2272 = vsyncadd [#allocation9], 4294967040  ;;  %vm459_vm0 = vcmask 261120   ;;  %s2919_s26 = sld [smem:[#allocation25_spill]] }
  0x85   : > { %v455_v2 = vld [vmem:[#allocation2] sm:$0xff]  ;;  %v456_v3 = vld [vmem:[#allocation2 + $0x8] sm:$0xff] }
  0x86   : > { %v460_v4 = vsel %vm459_vm0, %v455_v2, 0.0  ;;  %v463_v5 = vsel %vm459_vm0, %v456_v3, 0.0 }
  0x87   : > { %461 = vadd.xlane.f32.xlu0 %v460_v4  ;;  %v1761_v23 = vld [vmem:[%s2919_s26] ss:$0 sm:$0xff]  ;;  %v1762_v25 = vld [vmem:[%s2919_s26 + $0x1] ss:$0 sm:$0xff] }
  0x8b   : > { %464 = vadd.xlane.f32.xlu0 %v463_v5 }
 0x114   : > { %v462_v6 = vpop.xlane.xlu0 %461 }
 0x115   : > { %v467_v7 = vmul.f32 0.03125, %v462_v6 }
 0x117   : > { %v469_v8 = vsub.f32 %v455_v2, %v467_v7 }
 0x118   : > { %v465_v9 = vpop.xlane.xlu0 %464 }
 0x119   : > { %v468_v10 = vmul.f32 0.03125, %v465_v9  ;;  %v471_v11 = vmul.f32 %v469_v8, %v469_v8 }
 0x11b   : > { %v470_v12 = vsub.f32 %v456_v3, %v468_v10  ;;  %v473_v13 = vsel %vm459_vm0, %v471_v11, 0.0 }
 0x11c   : > { %474 = vadd.xlane.f32.xlu1 %v473_v13 }
 0x11d   : > { %v472_v14 = vmul.f32 %v470_v12, %v470_v12 }
 0x11f   : > { %v476_v15 = vsel %vm459_vm0, %v472_v14, 0.0 }
 0x120   : > { %477 = vadd.xlane.f32.xlu1 %v476_v15 }
 0x1a9   : > { %v475_v16 = vpop.xlane.xlu1 %474 }
 0x1aa   : > { %v479_v17 = vmul.f32 0.03125, %v475_v16 }
 0x1ac   : > { %v481_v18 = vadd.f32 1e-12, %v479_v17 }
 0x1ad   : > { %v478_v19 = vpop.xlane.xlu1 %477 }
 0x1ae   : > { %2073 = vrsqrt.f32 %v481_v18  ;;  %v480_v20 = vmul.f32 0.03125, %v478_v19 }
 0x1b0   : > { %v482_v21 = vadd.f32 1e-12, %v480_v20 }
 0x1b2   : > { %2075 = vrsqrt.f32 %v482_v21 }
 0x1b8   : > { %v2074_v22 = vpop.eup %2073 }
 0x1b9   : > { %v485_v24 = vmul.f32 %v2074_v22, %v469_v8 }
 0x1bb   : > { %v491_v26 = vmul.f32 %v1761_v23, %v485_v24 }
 0x1bc   : > { %v2076_v27 = vpop.eup %2075 }
 0x1bd   : > { %v497_v28 = vadd.f32 %v1762_v25, %v491_v26  ;;  %v486_v29 = vmul.f32 %v2076_v27, %v470_v12 }
 0x1bf   : > { %499 = vst.msk [vmem:[#allocation2] sm:$0xff] %vm459_vm0, %v497_v28  ;;  %v492_v30 = vmul.f32 %v1761_v23, %v486_v29 }
 0x1c1   : > { %v498_v31 = vadd.f32 %v1762_v25, %v492_v30 }
 0x1c3   : > { %500 = vst.msk [vmem:[#allocation2 + $0x8] sm:$0xff] %vm459_vm0, %v498_v31 }
 0x1c4 PF: > { %v2077_v32 = vld [vmem:[%s2592_s20] sm:$0xff]   ;;  %v2325_v33 = vmov 0.0   ;;  %v2078_v34 = vld [vmem:[%s2592_s20 + $0x8] sm:$0xff]   ;;  %vm2326_vm1 = vmmov 0   ;;  %vm525_vm2 = vcmask 261120   ;;  %v509_v38 = vlaneseq  ;;  %s2327_s17 = smov 96  }
 0x1c5   : > { %1835 = vmatprep.subr.bf16.mxu1 %v2325_v33  ;;  %1849 = vmatprep.subr.bf16.mxu0 %v2325_v33  ;;  %v2653_v41 = vld [vmem:[%s2607_s14] sm:$0xff]  ;;  %s2328_s20 = smov 120   ;;  %s2329_s14 = smov 88   ;;  %vm581_vm3 = vcmask 64512   ;;  %vm629_vm4 = vcmask 130048   ;;  %vm827_vm5 = vcmask 1043456  }
 0x1c6   : > { %1836 = vmatpush3.bf16.msra.mxu1 %v2077_v32  ;;  %1839 = vmatprep.mubr.msk.bf16.mxu1 %vm2326_vm1, %v2325_v33  ;;  %v2636_v35 = vld [vmem:[#allocation2] sm:$0xff]  ;;  %v2649_v39 = vshrl.u32 %v509_v38, 7  ;;  %s2330_s18 = smov 56   ;;  %s2331_s25 = smov 64   ;;  %vm1428_vm6 = vcmask 523264  }
 0x1c7   : > { %1837 = vmatprep.subr.bf16.mxu1 %v2325_v33  ;;  %1851 = vmatprep.mubr.msk.bf16.mxu0 %vm2326_vm1, %v2325_v33  ;;  %s2332_s16 = smov 80   ;;  %s2333_s15 = smov 112  }
 0x1c8   : > { %v511_v40 = vsub.s32 0, %v2649_v39  ;;  %s2334_s19 = smov 72   ;;  %s2335_s21 = smov 48  }
 0x1c9   : > { %s2336_s3 = smov 104   ;;  %s2337_s13 = smov 40  }
 0x1ca   : > { %v2638_v36 = vld [vmem:[#allocation2 + $0x8] sm:$0xff]  ;;  %1838 = vmatpush3.bf16.msra.mxu1 %v2078_v34  ;;  %v512_v42 = vrot.slane %v2653_v41, %v511_v40  ;;  %p1786_p9 = scmp.ne.s32.totalorder %s2303_s11, 1 }
 0x1cb   : > { %v503_v37 = vpack.c.bf16 %v2638_v36, %v2636_v35  ;;  %1843 = vmatprep.subr.bf16.mxu1 %v2325_v33  ;;  %vm2339_vm7 = vmmov (!%p1786_p9), 0   ;;  %s2922_s7 = sld [smem:[#allocation25_spill]] (!%p1786_p9)  ;;  %vm1581_vm8 = vcmask (!%p1786_p9), 253952  }
 0x1cd   : > { %1840 = vmatmul.mubr.msk.bf16.vlgmr.msra.gmra.mrb[0].mxu1 %vm525_vm2, %v503_v37 }
 0x1ce   : > { %1845 = vmatprep.mubr.msk.bf16.mxu1 %vm2326_vm1, %v2325_v33 }
 0x2a0   : > { %v563_v43 = vpop.f32.mrb[0].mxu1 }
 0x2a1   : > { %v564_v44 = vadd.f32 %v563_v43, %v512_v42  ;;  %v1841_v45 = vpop.f32.mrb[1].mxu1 }
 0x2a2   : > { %v566_v46 = vpop.f32.mrb[2].mxu1 }
 0x2a3   : > { %v567_v47 = vadd.f32 %v566_v46, %v512_v42  ;;  %v1842_v48 = vpop.f32.mrb[3].mxu1  ;;  %v570_v49 = vmul.f32 0.35355338, %v564_v44 }
 0x2a5   : > { %v571_v50 = vmul.f32 0.35355338, %v567_v47  ;;  %v2656_v51 = vpack.c.bf16 %v567_v47, %v564_v44  ;;  %v574_v47 = vld [vmem:[%s2597_s27] sm:$0xf] }
 0x2a6   : > { %v876_v48 = vsel %vm827_vm5, %v574_v47, 0 }
 0x2a7   : > { %v2658_v52 = vpack.c.bf16 %v571_v50, %v570_v49  ;;  %579 = vrot.lane.b32.xlu0 %v2656_v51, %s2327_s17  ;;  %v575_v49 = vld [vmem:[%s2597_s27 + $0x4] sm:$0xf] }
 0x2a8   : > { %v829_v50 = vsel %vm827_vm5, %v575_v49, 0 }
 0x2a9   : > { %702 = vrot.lane.b32.xlu1 %v2658_v52, %s2328_s20 }
 0x2ab   : > { %704 = vrot.lane.b32.xlu0 %v2656_v51, %s2329_s14 }
 0x319   : > { %v580_v53 = vpop.permute.xlu0 %579 }
 0x31a   : > { %v586_v54 = vsel %vm581_vm3, %v580_v53, 0 }
 0x31b   : > { %1844 = vmatpush3.bf16.xpose.msra.mxu1 %v586_v54  ;;  %v703_v57 = vpop.permute.xlu1 %702 }
 0x31c   : > { %1855 = vmatprep.subr.bf16.mxu1 %v2325_v33 }
 0x31d   : > { %v705_v55 = vpop.permute.xlu0 %704 }
 0x31e   : > { %v710_v56 = vsel %vm581_vm3, %v705_v55, 0 }
 0x322   : > { %1846 = vmatmul.mubr.msk.bf16.vlgmr.msra.gmra.mrb[4].mxu1 %vm581_vm3, %v2658_v52 }
 0x323   : > { %1856 = vmatpush3.bf16.xpose.msra.mxu1 %v710_v56  ;;  %1857 = vmatprep.mubr.msk.bf16.mxu1 %vm2326_vm1, %v2325_v33 }
 0x324   : > { %1867 = vmatprep.subr.bf16.mxu1 %v2325_v33 }
 0x32a   : > { %1858 = vmatmul.mubr.msk.bf16.vlgmr.msra.gmra.mrb[8].mxu1 %vm581_vm3, %v703_v57 }
 0x32b   : > { %1869 = vmatprep.mubr.msk.bf16.mxu1 %vm2326_vm1, %v2325_v33  ;;  %1868 = vmatpush3.bf16.msra.mxu1 %v829_v50 }
 0x32c   : > { %1879 = vmatprep.subr.bf16.mxu1 %v2325_v33 }
 0x3f5   : > { %v622_v58 = vpop.f32.mrb[4].mxu1 }
 0x3f6   : > { %v1847_v59 = vpop.f32.mrb[5].mxu1  ;;  %v630_v60 = vsel %vm629_vm4, %v622_v58, -inf }
 0x3f7   : > { %631 = vmax.xlane.f32.xlu1 %v630_v60  ;;  %v625_v61 = vpop.f32.mrb[6].mxu1 }
 0x3f8   : > { %v1848_v62 = vpop.f32.mrb[7].mxu1  ;;  %v633_v63 = vsel %vm629_vm4, %v625_v61, -inf }
 0x3f9   : > { %634 = vmax.xlane.f32.xlu0 %v633_v63 }
 0x3fd   : > { %v746_v0 = vpop.f32.mrb[8].mxu1 }
 0x3fe   : > { %v1859_v1 = vpop.f32.mrb[9].mxu1  ;;  %v753_v2 = vsel %vm629_vm4, %v746_v0, -inf }
 0x3ff   : > { %754 = vmax.xlane.f32.xlu0 %v753_v2  ;;  %v749_v3 = vpop.f32.mrb[10].mxu1 }
 0x400   : > { %v1860_v4 = vpop.f32.mrb[11].mxu1  ;;  %v756_v5 = vsel %vm629_vm4, %v749_v3, -inf }
 0x401   : > { %757 = vmax.xlane.f32.xlu1 %v756_v5 }
 0x484   : > { %v632_v6 = vpop.xlane.xlu1 %631 }
 0x485   : > { %v636_v7 = vsub.f32 %v622_v58, %v632_v6 }
 0x486   : > { %v635_v8 = vpop.xlane.xlu0 %634 }
 0x487   : > { %v638_v9 = vmul.f32 1.442695, %v636_v7  ;;  %v637_v10 = vsub.f32 %v625_v61, %v635_v8 }
 0x489   : > { %2085 = vpow2.f32 %v638_v9  ;;  %v640_v11 = vmul.f32 1.442695, %v637_v10 }
 0x48b   : > { %2087 = vpow2.f32 %v640_v11 }
 0x48c   : > { %v755_v12 = vpop.xlane.xlu0 %754 }
 0x48d   : > { %v759_v13 = vsub.f32 %v746_v0, %v755_v12 }
 0x48e   : > { %v758_v14 = vpop.xlane.xlu1 %757 }
 0x48f   : > { %v761_v15 = vmul.f32 1.442695, %v759_v13  ;;  %v760_v16 = vsub.f32 %v749_v3, %v758_v14 }
 0x491   : > { %2089 = vpow2.f32 %v761_v15  ;;  %v763_v17 = vmul.f32 1.442695, %v760_v16 }
 0x493   : > { %v2086_v18 = vpop.eup %2085  ;;  %2091 = vpow2.f32 %v763_v17 }
 0x494   : > { %v642_v19 = vsel %vm629_vm4, %v2086_v18, 0.0 }
 0x495   : > { %v2088_v20 = vpop.eup %2087  ;;  %643 = vadd.xlane.f32.xlu0 %v642_v19 }
 0x496   : > { %v645_v21 = vsel %vm629_vm4, %v2088_v20, 0.0 }
 0x497   : > { %646 = vadd.xlane.f32.xlu1 %v645_v21 }
 0x49b   : > { %v2090_v22 = vpop.eup %2089 }
 0x49c   : > { %v765_v23 = vsel %vm629_vm4, %v2090_v22, 0.0 }
 0x49d   : > { %v2092_v24 = vpop.eup %2091  ;;  %766 = vadd.xlane.f32.xlu0 %v765_v23 }
 0x49e   : > { %v768_v25 = vsel %vm629_vm4, %v2092_v24, 0.0 }
 0x49f   : > { %769 = vadd.xlane.f32.xlu1 %v768_v25 }
 0x4b0   : > { %776 = vrot.lane.b32.xlu1 %v2656_v51, %s2330_s18 }
 0x4b3   : > { %653 = vrot.lane.b32.xlu0 %v2656_v51, %s2331_s25 }
 0x4b4   : > { %921 = vrot.lane.b32.xlu1 %v2656_v51, %s2332_s16 }
 0x4b7   : > { %919 = vrot.lane.b32.xlu0 %v2658_v52, %s2333_s15 }
 0x522   : > { %v644_v26 = vpop.xlane.xlu0 %643 }
 0x523   : > { %2093 = vrcp.f32 %v644_v26 }
 0x524   : > { %v647_v27 = vpop.xlane.xlu1 %646 }
 0x525   : > { %2095 = vrcp.f32 %v647_v27 }
 0x52a   : > { %v767_v28 = vpop.xlane.xlu0 %766 }
 0x52b   : > { %2097 = vrcp.f32 %v767_v28 }
 0x52c   : > { %v770_v29 = vpop.xlane.xlu1 %769 }
 0x52d   : > { %v2094_v30 = vpop.eup %2093  ;;  %2099 = vrcp.f32 %v770_v29 }
 0x52e   : > { %v654_v31 = vpop.permute.xlu0 %653  ;;  %v650_v34 = vmul.f32 %v2094_v30, %v2086_v18 }
 0x52f   : > { %v2096_v32 = vpop.eup %2095  ;;  %1850 = vmatpush3.bf16.msra.mxu0 %v654_v31 }
 0x530   : > { %1861 = vmatprep.subr.bf16.mxu0 %v2325_v33  ;;  %v651_v37 = vmul.f32 %v2096_v32, %v2088_v20  ;;  %v777_v40 = vpop.permute.xlu1 %776 }
 0x532   : > { %v652_v38 = vpack.c.bf16 %v651_v37, %v650_v34  ;;  %v920_v1 = vpop.permute.xlu0 %919 }
 0x534   : > { %1852 = vmatmul.mubr.msk.bf16.vlgmr.msra.gmra.mrb[0].mxu0 %vm629_vm4, %v652_v38  ;;  %v922_v60 = vpop.permute.xlu1 %921 }
 0x535   : > { %v2098_v42 = vpop.eup %2097  ;;  %1862 = vmatpush3.bf16.msra.mxu0 %v777_v40  ;;  %1863 = vmatprep.mubr.msk.bf16.mxu0 %vm2326_vm1, %v2325_v33  ;;  %v927_v0 = vsel %vm581_vm3, %v922_v60, 0 }
 0x536   : > { %1873 = vmatprep.subr.bf16.mxu0 %v2325_v33  ;;  %v773_v44 = vmul.f32 %v2098_v42, %v2090_v22 }
 0x537   : > { %v2100_v43 = vpop.eup %2099 }
 0x538   : > { %v774_v45 = vmul.f32 %v2100_v43, %v2092_v24  ;;  %v576_v43 = vld [vmem:[%s2597_s27 + $0x8] sm:$0xf] }
 0x53a   : > { %v775_v46 = vpack.c.bf16 %v774_v45, %v773_v44  ;;  %v1045_v44 = vsel %vm827_vm5, %v576_v43, 0 }
 0x53c   : > { %1864 = vmatmul.mubr.msk.bf16.vlgmr.msra.gmra.mrb[4].mxu0 %vm629_vm4, %v775_v46 }
 0x53d   : > { %1875 = vmatprep.mubr.msk.bf16.mxu0 %vm2326_vm1, %v2325_v33  ;;  %1874 = vmatpush3.bf16.msra.mxu0 %v876_v48 }
 0x53e   : > { %1885 = vmatprep.subr.bf16.mxu0 %v2325_v33 }
 0x607   : > { %v693_v53 = vpop.f32.mrb[0].mxu0 }
 0x608   : > { %v1853_v54 = vpop.f32.mrb[1].mxu0 }
 0x609   : > { %v696_v55 = vpop.f32.mrb[2].mxu0 }
 0x60a   : > { %v700_v56 = vpack.c.bf16 %v696_v55, %v693_v53  ;;  %v1854_v57 = vpop.f32.mrb[3].mxu0 }
 0x60c   : > { %1876 = vmatmul.mubr.msk.bf16.vlgmr.msra.gmra.mrb[8].mxu0 %vm581_vm3, %v700_v56 }
 0x60d   : > { %1887 = vmatprep.mubr.msk.bf16.mxu0 %vm2326_vm1, %v2325_v33 }
 0x60f   : > { %v816_v58 = vpop.f32.mrb[4].mxu0 }
 0x610   : > { %v1865_v59 = vpop.f32.mrb[5].mxu0 }
 0x611   : > { %v819_v61 = vpop.f32.mrb[6].mxu0 }
 0x612   : > { %v823_v62 = vpack.c.bf16 %v819_v61, %v816_v58  ;;  %v1866_v63 = vpop.f32.mrb[7].mxu0 }
 0x614   : > { %1870 = vmatmul.mubr.msk.bf16.vlgmr.msra.gmra.mrb[12].mxu1 %vm581_vm3, %v823_v62 }
 0x615   : > { %1880 = vmatpush3.bf16.xpose.msra.mxu1 %v927_v0  ;;  %1881 = vmatprep.mubr.msk.bf16.mxu1 %vm2326_vm1, %v2325_v33 }
 0x616   : > { %1891 = vmatprep.subr.bf16.mxu1 %v2325_v33 }
 0x61c   : > { %1882 = vmatmul.mubr.msk.bf16.vlgmr.msra.gmra.mrb[16].mxu1 %vm581_vm3, %v920_v1 }
 0x61d   : > { %1893 = vmatprep.mubr.msk.bf16.mxu1 %vm2326_vm1, %v2325_v33  ;;  %1892 = vmatpush3.bf16.msra.mxu1 %v1045_v44 }
 0x61e   : > { %1903 = vmatprep.subr.bf16.mxu1 %v2325_v33 }
 0x6df   : > { %v912_v2 = vpop.f32.mrb[8].mxu0 }
 0x6e0   : > { %v1877_v3 = vpop.f32.mrb[9].mxu0 }
 0x6e1   : > { %v915_v4 = vpop.f32.mrb[10].mxu0 }
 0x6e2   : > { %v1878_v5 = vpop.f32.mrb[11].mxu0 }
 0x6e7   : > { %v865_v6 = vpop.f32.mrb[12].mxu1 }
 0x6e8   : > { %v2711_v7 = vadd.f32 %v912_v2, %v865_v6  ;;  %v1871_v8 = vpop.f32.mrb[13].mxu1 }
 0x6e9   : > { %v868_v9 = vpop.f32.mrb[14].mxu1 }
 0x6ea   : > { %v2713_v10 = vadd.f32 %v915_v4, %v868_v9  ;;  %v1872_v11 = vpop.f32.mrb[15].mxu1  ;;  %v577_v4 = vld [vmem:[%s2597_s27 + $0xc] sm:$0xf]  ;;  %s2920_s27 = scalar_lea.vmem [#allocation3], %s2575_s8 }
 0x6eb   : > { %v1216_v5 = vsel %vm827_vm5, %v577_v4, 0  ;;  %s2921_s26 = smov %s2920_s27 }
 0x6ef   : > { %v963_v12 = vpop.f32.mrb[16].mxu1 }
 0x6f0   : > { %v1883_v13 = vpop.f32.mrb[17].mxu1  ;;  %v970_v14 = vsel %vm629_vm4, %v963_v12, -inf }
 0x6f1   : > { %971 = vmax.xlane.f32.xlu1 %v970_v14  ;;  %v966_v15 = vpop.f32.mrb[18].mxu1 }
 0x6f2   : > { %v1884_v16 = vpop.f32.mrb[19].mxu1  ;;  %v973_v17 = vsel %vm629_vm4, %v966_v15, -inf }
 0x6f3   : > { %974 = vmax.xlane.f32.xlu0 %v973_v17 }
 0x77e   : > { %v972_v18 = vpop.xlane.xlu1 %971 }
 0x77f   : > { %v976_v19 = vsub.f32 %v963_v12, %v972_v18 }
 0x780   : > { %v975_v20 = vpop.xlane.xlu0 %974 }
 0x781   : > { %v978_v21 = vmul.f32 1.442695, %v976_v19  ;;  %v977_v22 = vsub.f32 %v966_v15, %v975_v20 }
 0x783   : > { %2101 = vpow2.f32 %v978_v21  ;;  %v980_v23 = vmul.f32 1.442695, %v977_v22 }
 0x785   : > { %2103 = vpow2.f32 %v980_v23 }
 0x78d   : > { %v2102_v24 = vpop.eup %2101 }
 0x78e   : > { %v982_v25 = vsel %vm629_vm4, %v2102_v24, 0.0 }
 0x78f   : > { %v2104_v26 = vpop.eup %2103  ;;  %983 = vadd.xlane.f32.xlu0 %v982_v25 }
 0x790   : > { %v985_v27 = vsel %vm629_vm4, %v2104_v26, 0.0 }
 0x791   : > { %986 = vadd.xlane.f32.xlu1 %v985_v27 }
 0x7a2   : > { %1092 = vrot.lane.b32.xlu1 %v2656_v51, %s2334_s19 }
 0x7a5   : > { %993 = vrot.lane.b32.xlu0 %v2656_v51, %s2335_s21 }
 0x7a6   : > { %1090 = vrot.lane.b32.xlu1 %v2658_v52, %s2336_s3 }
 0x81c   : > { %v984_v28 = vpop.xlane.xlu0 %983 }
 0x81d   : > { %2105 = vrcp.f32 %v984_v28 }
 0x81e   : > { %v987_v29 = vpop.xlane.xlu1 %986 }
 0x81f   : > { %2107 = vrcp.f32 %v987_v29 }
 0x820   : > { %v994_v30 = vpop.permute.xlu0 %993 }
 0x821   : > { %1886 = vmatpush3.bf16.msra.mxu0 %v994_v30 }
 0x822   : > { %1897 = vmatprep.subr.bf16.mxu0 %v2325_v33  ;;  %v1093_v38 = vpop.permute.xlu1 %1092 }
 0x823   : > { %v1098_v42 = vsel %vm581_vm3, %v1093_v38, 0 }
 0x826   : > { %v1091_v52 = vpop.permute.xlu1 %1090 }
 0x827   : > { %v2106_v31 = vpop.eup %2105 }
 0x828   : > { %v990_v34 = vmul.f32 %v2106_v31, %v2102_v24  ;;  %v1263_v24 = vsub.s32 1, %v2649_v39 }
 0x829   : > { %v2108_v32 = vpop.eup %2107 }
 0x82a   : > { %v991_v37 = vmul.f32 %v2108_v32, %v2104_v26  ;;  %v1264_v25 = vrot.slane %v2653_v41, %v1263_v24 }
 0x82c   : > { %v992_v40 = vpack.c.bf16 %v991_v37, %v990_v34 }
 0x82e   : > { %1888 = vmatmul.mubr.msk.bf16.vlgmr.msra.gmra.mrb[12].mxu0 %vm629_vm4, %v992_v40 }
 0x82f   : > { %1898 = vmatpush3.bf16.xpose.msra.mxu0 %v1098_v42  ;;  %1899 = vmatprep.mubr.msk.bf16.mxu0 %vm2326_vm1, %v2325_v33 }
 0x830   : > { %1909 = vmatprep.subr.bf16.mxu0 %v2325_v33 }
 0x836   : > { %1900 = vmatmul.mubr.msk.bf16.vlgmr.msra.gmra.mrb[16].mxu0 %vm581_vm3, %v1091_v52 }
 0x837   : > { %1911 = vmatprep.mubr.msk.bf16.mxu0 %vm2326_vm1, %v2325_v33  ;;  %1910 = vmatpush3.bf16.msra.mxu0 %v1216_v5 }
 0x838   : > { %1923 = vmatprep.subr.bf16.mxu0 %v2325_v33 }
 0x901   : > { %v1033_v45 = vpop.f32.mrb[12].mxu0 }
 0x902   : > { %v1889_v46 = vpop.f32.mrb[13].mxu0 }
 0x903   : > { %v1036_v47 = vpop.f32.mrb[14].mxu0 }
 0x904   : > { %v1040_v48 = vpack.c.bf16 %v1036_v47, %v1033_v45  ;;  %v1890_v49 = vpop.f32.mrb[15].mxu0 }
 0x906   : > { %1894 = vmatmul.mubr.msk.bf16.vlgmr.msra.gmra.mrb[20].mxu1 %vm581_vm3, %v1040_v48 }
 0x907   : > { %1905 = vmatprep.mubr.msk.bf16.mxu1 %vm2326_vm1, %v2325_v33 }
 0x909   : > { %v1134_v50 = vpop.f32.mrb[16].mxu0 }
 0x90a   : > { %v1901_v53 = vpop.f32.mrb[17].mxu0  ;;  %v1141_v54 = vsel %vm629_vm4, %v1134_v50, -inf }
 0x90b   : > { %1142 = vmax.xlane.f32.xlu0 %v1141_v54  ;;  %v1137_v55 = vpop.f32.mrb[18].mxu0  ;;  %v2080_v53 = vld [vmem:[%s2921_s26 + $0x8] sm:$0xff]  }
 0x90c   : > { %v1902_v56 = vpop.f32.mrb[19].mxu0  ;;  %v1144_v57 = vsel %vm629_vm4, %v1137_v55, -inf }
 0x90d   : > { %1145 = vmax.xlane.f32.xlu1 %v1144_v57 }
 0x91e   : > { %1164 = vrot.lane.b32.xlu1 %v2656_v51, %s2337_s13 }
 0x998   : > { %v1143_v58 = vpop.xlane.xlu0 %1142 }
 0x999   : > { %v1147_v59 = vsub.f32 %v1134_v50, %v1143_v58 }
 0x99a   : > { %v1146_v60 = vpop.xlane.xlu1 %1145 }
 0x99b   : > { %v1149_v61 = vmul.f32 1.442695, %v1147_v59  ;;  %v1148_v62 = vsub.f32 %v1137_v55, %v1146_v60  ;;  %v1298_v60 = vsub.s32 2, %v2649_v39 }
 0x99d   : > { %2109 = vpow2.f32 %v1149_v61  ;;  %v1151_v63 = vmul.f32 1.442695, %v1148_v62  ;;  %v1299_v62 = vrot.slane %v2653_v41, %v1298_v60 }
 0x99e   : > { %v1165_v0 = vpop.permute.xlu1 %1164 }
 0x99f   : > { %2111 = vpow2.f32 %v1151_v63  ;;  %1904 = vmatpush3.bf16.msra.mxu1 %v1165_v0  ;;  %v1304_v0 = vsub.s32 3, %v2649_v39 }
 0x9a0   : > { %1915 = vmatprep.subr.bf16.mxu1 %v2325_v33 }
 0x9a7   : > { %v2110_v1 = vpop.eup %2109 }
 0x9a8   : > { %v1153_v2 = vsel %vm629_vm4, %v2110_v1, 0.0 }
 0x9a9   : > { %v2112_v3 = vpop.eup %2111  ;;  %1154 = vadd.xlane.f32.xlu0 %v1153_v2 }
 0x9aa   : > { %v1156_v51 = vsel %vm629_vm4, %v2112_v3, 0.0 }
 0x9ad   : > { %1157 = vadd.xlane.f32.xlu0 %v1156_v51  ;;  %v1305_v51 = vrot.slane %v2653_v41, %v1304_v0 }
 0x9d9   : > { %v1081_v6 = vpop.f32.mrb[20].mxu1 }
 0x9da   : > { %v1088_v8 = vadd.f32 %v1081_v6, %v2711_v7  ;;  %v1895_v9 = vpop.f32.mrb[21].mxu1 }
 0x9db   : > { %v1084_v11 = vpop.f32.mrb[22].mxu1  ;;  %v2081_v9 = vld [vmem:[%s2602_s22] sm:$0xff]  }
 0x9dc   : > { %v1089_v12 = vadd.f32 %v1084_v11, %v2713_v10  ;;  %v1896_v13 = vpop.f32.mrb[23].mxu1  ;;  %v2082_v11 = vld [vmem:[%s2602_s22 + $0x8] sm:$0xff]  }
 0x9dd   : > { %v2084_v13 = vld [vmem:[%s2602_s22 + $0x18] sm:$0xff]  }
 0xa36   : > { %v1155_v14 = vpop.xlane.xlu0 %1154 }
 0xa37   : > { %2113 = vrcp.f32 %v1155_v14  ;;  %v1315_v14 = vsub.s32 4, %v2649_v39 }
 0xa3a   : > { %v1158_v15 = vpop.xlane.xlu0 %1157 }
 0xa3b   : > { %2115 = vrcp.f32 %v1158_v15  ;;  %v1316_v15 = vrot.slane %v2653_v41, %v1315_v14 }
 0xa41   : > { %v2114_v16 = vpop.eup %2113 }
 0xa42   : > { %v1161_v18 = vmul.f32 %v2114_v16, %v2110_v1 }
 0xa45   : > { %v2116_v17 = vpop.eup %2115 }
 0xa46   : > { %v1162_v19 = vmul.f32 %v2116_v17, %v2112_v3 }
 0xa48   : > { %v1163_v20 = vpack.c.bf16 %v1162_v19, %v1161_v18 }
 0xa4a   : > { %1906 = vmatmul.mubr.msk.bf16.vlgmr.msra.gmra.mrb[24].mxu1 %vm629_vm4, %v1163_v20 }
 0xa4b   : > { %1919 = vmatprep.mubr.msk.bf16.mxu1 %vm2326_vm1, %v2325_v33 }
 0xb1d   : > { %v1204_v7 = vpop.f32.mrb[24].mxu1 }
 0xb1e   : > { %v1907_v21 = vpop.f32.mrb[25].mxu1 }
 0xb1f   : > { %v1207_v22 = vpop.f32.mrb[26].mxu1 }
 0xb20   : > { %v1211_v23 = vpack.c.bf16 %v1207_v22, %v1204_v7  ;;  %v1908_v10 = vpop.f32.mrb[27].mxu1 }
 0xb22   : > { %1912 = vmatmul.mubr.msk.bf16.vlgmr.msra.gmra.mrb[20].mxu0 %vm581_vm3, %v1211_v23 }
 0xb23   : > { %1931 = vmatprep.mubr.msk.bf16.mxu0 %vm2326_vm1, %v2325_v33  ;;  %1924 = vmatpush3.bf16.msra.mxu0 %v2081_v9 }
 0xb24   : > { %1925 = vmatprep.subr.bf16.mxu0 %v2325_v33 }
 0xb27   : > { %1926 = vmatpush3.bf16.msra.mxu0 %v2082_v11 }
 0xb28   : > { %1927 = vmatprep.subr.bf16.mxu0 %v2325_v33 }
 0xbf5   : > { %v1252_v26 = vpop.f32.mrb[20].mxu0 }
 0xbf6   : > { %v1259_v27 = vadd.f32 %v1252_v26, %v1088_v8  ;;  %v1913_v28 = vpop.f32.mrb[21].mxu0 }
 0xbf7   : > { %v1255_v29 = vpop.f32.mrb[22].mxu0 }
 0xbf8   : > { %v1265_v30 = vadd.f32 %v1264_v25, %v1259_v27  ;;  %v1260_v31 = vadd.f32 %v1255_v29, %v1089_v12  ;;  %v1914_v32 = vpop.f32.mrb[23].mxu0  ;;  %v2083_v12 = vld [vmem:[%s2602_s22 + $0x10] sm:$0xff]  }
 0xbf9   : > { %1928 = vmatpush3.bf16.msra.mxu0 %v2083_v12 }
 0xbfa   : > { %v1266_v34 = vadd.f32 %v1264_v25, %v1260_v31  ;;  %v1267_v37 = vadd.f32 %v1265_v30, %v2636_v35  ;;  %1929 = vmatprep.subr.bf16.mxu0 %v2325_v33 }
 0xbfc   : > { %v1269_v38 = vsel %vm525_vm2, %v1267_v37, 0.0  ;;  %v1268_v40 = vadd.f32 %v1266_v34, %v2638_v36  ;;  %v2079_v36 = vld [vmem:[%s2920_s27] sm:$0xff]  }
 0xbfd   : > { %1270 = vadd.xlane.f32.xlu0 %v1269_v38  ;;  %1916 = vmatpush3.bf16.msra.mxu1 %v2079_v36 }
 0xbfe   : > { %v1272_v42 = vsel %vm525_vm2, %v1268_v40, 0.0  ;;  %1917 = vmatprep.subr.bf16.mxu1 %v2325_v33  ;;  %1930 = vmatpush3.bf16.msra.mxu0 %v2084_v13 }
 0xc01   : > { %1273 = vadd.xlane.f32.xlu0 %v1272_v42  ;;  %1918 = vmatpush3.bf16.msra.mxu1 %v2080_v53 }
 0xc8a   : > { %v1271_v52 = vpop.xlane.xlu0 %1270 }
 0xc8b   : > { %v1276_v43 = vmul.f32 0.03125, %v1271_v52  ;;  %v1402_v52 = vsub.s32 5, %v2649_v39 }
 0xc8d   : > { %v1278_v44 = vsub.f32 %v1267_v37, %v1276_v43  ;;  %v1403_v43 = vrot.slane %v2653_v41, %v1402_v52 }
 0xc8e   : > { %v1274_v45 = vpop.xlane.xlu0 %1273 }
 0xc8f   : > { %v1277_v46 = vmul.f32 0.03125, %v1274_v45  ;;  %v1280_v47 = vmul.f32 %v1278_v44, %v1278_v44 }
 0xc91   : > { %v1279_v48 = vsub.f32 %v1268_v40, %v1277_v46  ;;  %v1282_v49 = vsel %vm525_vm2, %v1280_v47, 0.0 }
 0xc92   : > { %1283 = vadd.xlane.f32.xlu0 %v1282_v49 }
 0xc93   : > { %v1281_v35 = vmul.f32 %v1279_v48, %v1279_v48 }
 0xc95   : > { %v1285_v50 = vsel %vm525_vm2, %v1281_v35, 0.0 }
 0xc96   : > { %1286 = vadd.xlane.f32.xlu0 %v1285_v50 }
 0xd1f   : > { %v1284_v54 = vpop.xlane.xlu0 %1283 }
 0xd20   : > { %v1288_v55 = vmul.f32 0.03125, %v1284_v54 }
 0xd22   : > { %v1290_v56 = vadd.f32 1e-12, %v1288_v55 }
 0xd23   : > { %v1287_v57 = vpop.xlane.xlu0 %1286 }
 0xd24   : > { %2117 = vrsqrt.f32 %v1290_v56  ;;  %v1289_v58 = vmul.f32 0.03125, %v1287_v57 }
 0xd26   : > { %v1291_v59 = vadd.f32 1e-12, %v1289_v58 }
 0xd28   : > { %2119 = vrsqrt.f32 %v1291_v59 }
 0xd2e   : > { %v2118_v61 = vpop.eup %2117 }
 0xd2f   : > { %v1294_v63 = vmul.f32 %v2118_v61, %v1278_v44 }
 0xd31   : > { %v1300_v2 = vmul.f32 %v1299_v62, %v1294_v63 }
 0xd32   : > { %v2120_v1 = vpop.eup %2119 }
 0xd33   : > { %v1295_v3 = vmul.f32 %v2120_v1, %v1279_v48  ;;  %v1306_v5 = vadd.f32 %v1305_v51, %v1300_v2 }
 0xd35   : > { %v1301_v4 = vmul.f32 %v1299_v62, %v1295_v3 }
 0xd37   : > { %v1307_v6 = vadd.f32 %v1305_v51, %v1301_v4 }
 0xd39   : > { %v1308_v8 = vpack.c.bf16 %v1307_v6, %v1306_v5 }
 0xd3b   : > { %1920 = vmatmul.mubr.msk.bf16.vlgmr.msra.gmra.mrb[28].mxu1 %vm525_vm2, %v1308_v8 }
 0xe0e   : > { %v1366_v16 = vpop.f32.mrb[28].mxu1 }
 0xe0f   : > { %v1367_v17 = vadd.f32 %v1366_v16, %v1316_v15  ;;  %v1921_v18 = vpop.f32.mrb[29].mxu1 }
 0xe10   : > { %v1369_v19 = vpop.f32.mrb[30].mxu1 }
 0xe11   : > { %v1375_v20 = vmul.f32 0.044715, %v1367_v17  ;;  %v1370_v7 = vadd.f32 %v1369_v19, %v1316_v15  ;;  %v1922_v21 = vpop.f32.mrb[31].mxu1  ;;  %v1373_v32 = vmul.f32 0.5, %v1367_v17  ;;  %v2338_v19 = vmov (!%p1786_p9), 0.0  }
 0xe12   : > { %1935 = vmatprep.subr.bf16.mxu0 (!%p1786_p9), %v2338_v19 }
 0xe13   : > { %v1377_v22 = vmul.f32 %v1375_v20, %v1367_v17  ;;  %v1376_v23 = vmul.f32 0.044715, %v1370_v7  ;;  %v1374_v34 = vmul.f32 0.5, %v1370_v7  ;;  %v2130_v20 = vld [vmem:[#allocation6 + $0x8] sm:$0xff] (!%p1786_p9)  }
 0xe15   : > { %v1379_v10 = vmul.f32 %v1377_v22, %v1367_v17  ;;  %v1378_v24 = vmul.f32 %v1376_v23, %v1370_v7 }
 0xe17   : > { %v1381_v25 = vadd.f32 %v1379_v10, %v1367_v17  ;;  %v1380_v26 = vmul.f32 %v1378_v24, %v1370_v7 }
 0xe19   : > { %v1383_v27 = vmul.f32 0.7978846, %v1381_v25  ;;  %v1382_v33 = vadd.f32 %v1380_v26, %v1370_v7  ;;  %v1524_v7 = vld [vmem:[%s2922_s7 + $0x2] sm:$0x1] (!%p1786_p9) }
 0xe1b   : > { %2121 = vtanh.f32 %v1383_v27  ;;  %v1384_v28 = vmul.f32 0.7978846, %v1382_v33 }
 0xe1d   : > { %2123 = vtanh.f32 %v1384_v28 }
 0xe25   : > { %v2122_v29 = vpop.eup %2121 }
 0xe26   : > { %v1387_v30 = vadd.f32 1.0, %v2122_v29 }
 0xe27   : > { %v2124_v31 = vpop.eup %2123 }
 0xe28   : > { %v1388_v37 = vadd.f32 1.0, %v2124_v31  ;;  %v1389_v38 = vmul.f32 %v1387_v30, %v1373_v32 }
 0xe2a   : > { %v1390_v40 = vmul.f32 %v1388_v37, %v1374_v34 }
 0xe2c   : > { %v1391_v42 = vpack.c.bf16 %v1390_v40, %v1389_v38 }
 0xe2e   : > { %1932 = vmatmul.mubr.msk.bf16.vlgmr.msra.gmra.mrb[24].mxu0 %vm1428_vm6, %v1391_v42 }
 0xe2f   : > { %1939 = vmatprep.mubr.msk.bf16.mxu0 (!%p1786_p9), %vm2339_vm7, %v2338_v19 }
 0xf01   : > { %v1466_v44 = vpop.f32.mrb[24].mxu0 }
 0xf02   : > { %v1467_v45 = vadd.f32 %v1466_v44, %v1403_v43  ;;  %v1933_v46 = vpop.f32.mrb[25].mxu0 }
 0xf03   : > { %v1469_v47 = vpop.f32.mrb[26].mxu0 }
 0xf04   : > { %v1470_v48 = vadd.f32 %v1469_v47, %v1403_v43  ;;  %v1934_v49 = vpop.f32.mrb[27].mxu0  ;;  %v1473_v35 = vadd.f32 %v1467_v45, %v1306_v5  ;;  %v1503_v5 = vsub.s32 6, %v2649_v39 }
 0xf06   : > { %v1475_v50 = vsel %vm525_vm2, %v1473_v35, 0.0  ;;  %v1474_v36 = vadd.f32 %v1470_v48, %v1307_v6  ;;  %v1509_v6 = vsub.s32 7, %v2649_v39  ;;  %v1504_v8 = vrot.slane %v2653_v41, %v1503_v5  ;;  %v2129_v39 = vld [vmem:[#allocation6] sm:$0xff] (!%p1786_p9)  }
 0xf07   : > { %1476 = vadd.xlane.f32.xlu1 %v1475_v50  ;;  %1936 = vmatpush3.bf16.msra.mxu0 (!%p1786_p9), %v2129_v39 }
 0xf08   : > { %v1478_v53 = vsel %vm525_vm2, %v1474_v36, 0.0  ;;  %v1510_v11 = vrot.slane %v2653_v41, %v1509_v6  ;;  %1937 = vmatprep.subr.bf16.mxu0 (!%p1786_p9), %v2338_v19 }
 0xf09   : > { %1479 = vadd.xlane.f32.xlu0 %v1478_v53 }
 0xf0b   : > { %1938 = vmatpush3.bf16.msra.mxu0 (!%p1786_p9), %v2130_v20 }
 0xf94   : > { %v1477_v54 = vpop.xlane.xlu1 %1476 }
 0xf95   : > { %v1481_v55 = vmul.f32 0.03125, %v1477_v54 }
 0xf96   : > { %v1480_v56 = vpop.xlane.xlu0 %1479 }
 0xf97   : > { %v1483_v57 = vsub.f32 %v1473_v35, %v1481_v55  ;;  %v1482_v58 = vmul.f32 0.03125, %v1480_v56 }
 0xf99   : > { %v1484_v59 = vsub.f32 %v1474_v36, %v1482_v58  ;;  %v1485_v60 = vmul.f32 %v1483_v57, %v1483_v57 }
 0xf9b   : > { %v1487_v61 = vsel %vm525_vm2, %v1485_v60, 0.0  ;;  %v1486_v62 = vmul.f32 %v1484_v59, %v1484_v59 }
 0xf9c   : > { %1488 = vadd.xlane.f32.xlu0 %v1487_v61 }
 0xf9d   : > { %v1490_v63 = vsel %vm525_vm2, %v1486_v62, 0.0 }
 0xfa0   : > { %1491 = vadd.xlane.f32.xlu0 %v1490_v63 }
0x1029   : > { %v1489_v0 = vpop.xlane.xlu0 %1488 }
0x102a   : > { %v1493_v1 = vmul.f32 0.03125, %v1489_v0 }
0x102c   : > { %v1495_v2 = vadd.f32 1e-12, %v1493_v1 }
0x102d   : > { %v1492_v3 = vpop.xlane.xlu0 %1491 }
0x102e   : > { %2125 = vrsqrt.f32 %v1495_v2  ;;  %v1494_v51 = vmul.f32 0.03125, %v1492_v3 }
0x1030   : > { %v1496_v4 = vadd.f32 1e-12, %v1494_v51 }
0x1032   : > { %2127 = vrsqrt.f32 %v1496_v4 }
0x1038   : > { %v2126_v9 = vpop.eup %2125 }
0x1039   : > { %v1499_v12 = vmul.f32 %v2126_v9, %v1483_v57 }
0x103b   : > { %v1505_v13 = vmul.f32 %v1504_v8, %v1499_v12 }
0x103c   : > { %v2128_v14 = vpop.eup %2127 }
0x103d   : > { %v1511_v15 = vadd.f32 %v1510_v11, %v1505_v13  ;;  %v1500_v16 = vmul.f32 %v2128_v14, %v1484_v59  ;;  %1518 = sbr.rel (%p1786_p9) target bundleno = 4387 (0x1123), region = 99 }
0x103f   : > { %1513 = vst.msk [vmem:[#allocation2] sm:$0xff] %vm525_vm2, %v1511_v15  ;;  %v1506_v17 = vmul.f32 %v1504_v8, %v1500_v16  ;;  %v1519_v41 = vpack.c.bf16 (!%p1786_p9), %v1511_v15, %v1511_v15 }
0x1041   : > { %v1512_v18 = vadd.f32 %v1510_v11, %v1506_v17  ;;  %1940 = vmatmul.mubr.msk.bf16.vlgmr.msra.gmra.mrb[0].mxu0 (!%p1786_p9), %vm525_vm2, %v1519_v41 }
0x1043   : > { %1514 = vst.msk [vmem:[#allocation2 + $0x8] sm:$0xff] %vm525_vm2, %v1512_v18 }
0x1114   : > { %v1574_v21 = vpop.f32.mrb[0].mxu0 }
0x1115   : > { %v1575_v22 = vadd.f32 %v1574_v21, %v1524_v7  ;;  %v1941_v23 = vpop.f32.mrb[1].mxu0 }
0x1116   : > { %v1577_v10 = vpop.f32.mrb[2].mxu0 }
0x1117   : > { %2131 = vtanh.f32 %v1575_v22  ;;  %v1942_v24 = vpop.f32.mrb[3].mxu0 }
0x1121   : > { %v2132_v25 = vpop.eup %2131 }
0x1122   : > { %1582 = vst.msk [vmem:[%s2611_s6] sm:$0x1] %vm1581_vm8, %v2132_v25 }
0x1123 PF: > { %s2923_s11 = sld [smem:[#allocation19_spill]]  ;;  %s1790_s23 = sshll.u32 %s2307_s12, 4 }
0x1124   : > { %s2924_s14 = sld [smem:[#allocation26_spill]]  ;;  %s1596_s16 = sshll.u32 %s2611_s6, 4  ;;  %s1597_s16 = int_to_ptr.vmem [resolvable:$true] %s1596_s16 }
0x1125   : > { %s2926_s15 = sand.u32 1, %s2283_s28   ;;  %s2191_s21 = scalar_lea.vmem %s1597_s16, 16 }
0x1126   : > { %s1584_s19 = scalar_lea.sflag [#allocation5], %s2926_s15  ;;  %p2192_p11 = scmp.ne.s32.totalorder %s1597_s16, %s2191_s21 }
0x1127   : > { %s2340_s3 = smov [#allocation8]  }
0x1128   : > { %s2195_s13 = sshll.u32 %s2340_s3, 4  ;;  %s2196_s13 = int_to_ptr.vmem [resolvable:$false] %s2195_s13 }
0x1129   : > { %p2927_p0 = scmp.ne.s32.totalorder %s2923_s11, 0  ;;  %s2197_s27 = scalar_lea.vmem %s2196_s13, 32 }
0x112a   : > { %s2925_s18 = smov %s2924_s14  ;;  %s2803_s25 = scalar_lea.hbm %s2924_s14, %s1790_s23 }
0x112b   : > { %p2193_p13 = pnand %p2192_p11, %p2927_p0  ;;  %p2198_p5 = scmp.lt.s32.totalorder %s1597_s16, %s2196_s13 }
0x112c   : > { %p2199_p8 = scmp.lt.s32.totalorder %s2197_s27, %s2191_s21 }
0x112d   : > { %p2194_p2 = pneg %p2193_p13 }
0x112e   : > { %p2200_p12 = por %p2199_p8, %p2198_p5 }
0x1130   : > { %p2201_p1 = pnand %p2200_p12, %p2194_p2 }
0x1132   : > { %2204 = shalt.err (!%p2201_p1)
}
0x1133   : > { %s2205_s12 = scalar_lea.hbm %s2803_s25, 16  ;;  %s2209_s8 = scalar_lea.hbm %s2925_s18, 32 }
0x1134   : > { %p2206_p6 = scmp.ne.s32.totalorder %s2803_s25, %s2205_s12  ;;  %p2210_p4 = scmp.lt.u32.totalorder %s2803_s25, %s2925_s18 }
0x1135   : > { %p2211_p7 = scmp.lt.u32.totalorder %s2209_s8, %s2205_s12  ;;  %p2213_p11 = scmp.lt.u32.totalorder %s2205_s12, %s2803_s25 }
0x1136   : > { %p2207_p10 = pnand %p2206_p6, %p2927_p0 }
0x1137   : > { %p2212_p9 = por %p2211_p7, %p2210_p4 }
0x1138   : > { %p2208_p3 = pneg %p2207_p10 }
0x1139   : > { %p2214_p13 = por %p2213_p11, %p2212_p9 }
0x113b   : > { %p2215_p2 = pnand %p2214_p13, %p2208_p3 }
0x113d   : > { %2218 = shalt.err (!%p2215_p2)
}
0x113e   : > { %1949 = dma.vmem_to_hbm [thread:$0]  (%p2927_p0), %s1597_s16, 16, %s2803_s25, %s1584_s19  }
0x113f PF: > { %s2928_s23 = sld [smem:[#allocation18_spill]]  ;;  %s2929_s17 = sld [smem:[#allocation15_spill]] }
0x1140   : > { %s2930_s20 = sld [smem:[#allocation20_spill]] }
0x1145   : > { %p1966_p5 = scmp.ge.s32.totalorder %s2928_s23, 2  ;;  %s1608_s14 = sand.u32 1, %s2929_s17  }
0x1146   : > { %p2931_p8 = scmp.ne.s32.totalorder %s2930_s20, 0  ;;  %s1609_s15 = scalar_lea.sflag [#allocation5], %s1608_s14 }
0x1148   : > { %p1960_p12 = pnand %p1966_p5, %p2931_p8 }
0x114a   : > { %2274 = dma.done.wait (!%p1960_p12), %s1609_s15, 16  }
0x114b   : > { %2276 = vsyncadd (!%p1960_p12), %s1609_s15, 4294967280  ;;  %s25_s15 = sadd.s32 1, %s2928_s23   ;;  %s2932_s11 = sld [smem:[#allocation16_spill]] }
0x114c   : > { %p22_p1 = scmp.ge.s32.totalorder %s25_s15, 6   ;;  %s2933_s12 = sld [smem:[#allocation17_spill]] }
0x114d   : > { %s2934_s13 = sld [smem:[#allocation21_spill]]  ;;  %s2935_s14 = sld [smem:[#allocation22_spill]] }
0x114e   : > { %s2936_s27 = smov %s2283_s28  ;;  %s2937_s28 = smov %s2287_s29 }
0x114f   : > { %s2938_s29 = smov %s2526_s30  ;;  %s2939_s30 = smov %s2295_s9 }
0x1150   : > { %s2940_s9 = smov %s2299_s10  ;;  %s2941_s10 = smov %s2517_s24 }
0x1151   :  { %24 = sbr.rel (!%p22_p1) target bundleno = 15 (0xf), region = 161 }
0x1158   :  { %1613 = vsyncpa [#allocation4], 1 }
0x1159   :  { %1615 = vsyncpa [#allocation4 + $0x1], 1 }
0x115a   :  { %1616 = vsyncpa [#allocation7], 1 }
0x115b   :  { %1617 = vsyncpa [#allocation5], 1 }
0x115c   :  { %1619 = vsyncpa [#allocation5 + $0x1], 1 }

</bundles_post_ra>
